<compile_context>
chip_gen: v5e
topology: v5e:2x2
jax: 0.10.0
libtpu: 0.0.40
codegen_flags: <defaults>
</compile_context>

<pallas_src>
import math
import functools

import jax
import jax.numpy as jnp
from jax.experimental import pallas as pl
from jax.experimental.pallas import tpu as pltpu


# ----------------------------- in-kernel helpers -----------------------------

def _layer_norm(x, alpha, bias, d_model, eps=1e-6):
    # Matches the PyTorch `Norm` module: alpha * (x - mean) / (std + eps) + bias,
    # with torch.std's unbiased estimator (ddof=1). Exact division (correctness review).
    mean = jnp.mean(x, axis=-1, keepdims=True)
    centered = x - mean
    var = jnp.sum(centered * centered, axis=-1, keepdims=True) * (1.0 / (d_model - 1))
    std = jnp.sqrt(var)
    return alpha * centered / (std + eps) + bias


def _bmm(a, b, ca, cb):
    # Leading-batch 3-D dot_general: batch dim 0, contract a-dim `ca` with b-dim `cb`.
    return jax.lax.dot_general(
        a, b, (((ca,), (cb,)), ((0,), (0,))),
        preferred_element_type=jnp.float32)


# ----------------------------- fused kernel -----------------------------

def encoder_stack_kernel(x_ref, mask_ref,
                         n1a_ref, n1b_ref,
                         wqkv_ref, bqkv_ref, wo_ref, bo_ref,
                         n3a_ref, n3b_ref,
                         w1_ref, b1_ref, w2_ref, b2_ref,
                         fna_ref, fnb_ref,
                         o_ref, *, heads, n_layers, bb):
    S = x_ref.shape[1]
    d_model = x_ref.shape[2]
    dk = d_model // heads
    bf16 = jnp.bfloat16

    # Fold the per-step batch chunk into the sublane / matmul-M dimension: [bb*S, D].
    if bb == 1:
        x = x_ref[0]
    else:
        x = jnp.concatenate([x_ref[i] for i in range(bb)], axis=0)

    # Additive mask computed ONCE for the whole stack: 0 = keep, -1e9 = masked.
    neg_mask = ((mask_ref[...] - 1.0) * 1e9)[None, :, :]          # [1, S, S]

    for l in range(n_layers):      # static unroll (fine at small N; see scaling TODO above)
        # ---- pre-norm multi-head self-attention + residual ----
        x2 = _layer_norm(x, n1a_ref[l], n1b_ref[l], d_model)      # [bb*S, D] f32
        # Single lane-dense fused QKV matmul; 1/sqrt(dk) already folded into the Q slice.
        qkv = jnp.dot(x2.astype(bf16), wqkv_ref[l],
                      preferred_element_type=jnp.float32) + bqkv_ref[l]   # [bb*S, 3*D]

        def heads_of(col0):
            # [bb*S, 3*D] -> [bb*heads, S, dk] via static sublane/lane slices (cheap shuffles).
            parts = []
            for b in range(bb):
                rows = qkv[b * S:(b + 1) * S, :]
                for h in range(heads):
                    parts.append(rows[:, col0 + h * dk: col0 + (h + 1) * dk])
            return jnp.stack(parts, axis=0).astype(bf16)

        q = heads_of(0)
        k = heads_of(d_model)
        v = heads_of(2 * d_model)

        sc = _bmm(q, k, 2, 2)                                     # [bb*H, S, S] f32
        sc = sc + neg_mask
        sc = sc - jnp.max(sc, axis=-1, keepdims=True)
        p = jnp.exp(sc)
        p = p * pl.reciprocal(jnp.sum(p, axis=-1, keepdims=True), approx=True)

        ctx = _bmm(p.astype(bf16), v, 2, 1)                       # [bb*H, S, dk] f32

        # Re-group heads back to [bb*S, H*dk] (lane concats on otherwise-idle units),
        # then ONE lane-dense output-projection matmul instead of per-head matmuls + reduce.
        rows = [jnp.concatenate([ctx[b * heads + h] for h in range(heads)], axis=-1)
                for b in range(bb)]
        ctx_flat = rows[0] if bb == 1 else jnp.concatenate(rows, axis=0)

        attn = jnp.dot(ctx_flat.astype(bf16), wo_ref[l],
                       preferred_element_type=jnp.float32) + bo_ref[l]    # [bb*S, D]
        x = x + attn

        # ---- pre-norm feed-forward + residual ----
        x2 = _layer_norm(x, n3a_ref[l], n3b_ref[l], d_model)
        h1 = jnp.dot(x2.astype(bf16), w1_ref[l],
                     preferred_element_type=jnp.float32) + b1_ref[l]
        h1 = jnp.maximum(h1, 0.0)                                 # ReLU
        ff = jnp.dot(h1.astype(bf16), w2_ref[l],
                     preferred_element_type=jnp.float32) + b2_ref[l]
        x = x + ff

    # ---- final Norm; output written exactly once per grid step ----
    # NOTE: at S*D = 256 total elements the store cannot be made a full unmasked
    # [8,128] vreg store either way; lane-dense repacking would cost more shuffles
    # than the masked store it saves, so we keep the natural [S, D] layout here.
    y = _layer_norm(x, fna_ref[...], fnb_ref[...], d_model)
    for i in range(bb):
        o_ref[i] = y[i * S:(i + 1) * S, :]


# ----------------------------- wrapper -----------------------------

def _grid_for_batch(B):
    # v7x has 2 TensorCores/chip -> keep a 2-wide "parallel" grid so both stay busy.
    # Single-TC chips (v5e / v6e) -> fold the whole batch into one grid step.
    try:
        n_tc = 2 if "v7" in jax.devices()[0].device_kind.lower() else 1
    except Exception:  # pragma: no cover - conservative fallback
        n_tc = 1
    n_steps = n_tc if (n_tc > 1 and B % n_tc == 0) else 1
    return n_steps, B // n_steps


def run_encoder_stack(x, mask, sp, norm_a, norm_b, *, heads, n_layers):
    B, S, D = x.shape
    n_steps, bb = _grid_for_batch(B)
    weights = [sp["n1a"], sp["n1b"],
               sp["wqkv"], sp["bqkv"], sp["wo"], sp["bo"],
               sp["n3a"], sp["n3b"],
               sp["w1"], sp["b1"], sp["w2"], sp["b2"],
               norm_a, norm_b]
    # Weights / mask: whole arrays resident in VMEM, single-buffered (no pipelining).
    vmem_spec = pl.BlockSpec(memory_space=pltpu.MemorySpace.VMEM)
    in_specs = ([pl.BlockSpec((bb, S, D), lambda b: (b, 0, 0)), vmem_spec]
                + [vmem_spec] * len(weights))
    return pl.pallas_call(
        functools.partial(encoder_stack_kernel,
                          heads=heads, n_layers=n_layers, bb=bb),
        out_shape=jax.ShapeDtypeStruct((B, S, D), x.dtype),
        grid=(n_steps,),
        in_specs=in_specs,
        out_specs=pl.BlockSpec((bb, S, D), lambda b: (b, 0, 0)),
        compiler_params=pltpu.CompilerParams(dimension_semantics=("parallel",)),
    )(x, mask, *weights)


# ----------------------------- params / glue -----------------------------

def init_params(key, vocab_size, d_model, N, heads, d_ff):
    dk = d_model // heads
    keys = jax.random.split(key, 1 + N)
    embed = 0.02 * jax.random.normal(keys[0], (vocab_size, d_model), jnp.float32)

    def lin(k, fan_in, fan_out):
        bound = 1.0 / math.sqrt(fan_in)
        return jax.random.uniform(k, (fan_in, fan_out), jnp.float32, -bound, bound)

    names = ["n1a", "n1b", "wqkv", "bqkv", "wo", "bo",
             "n3a", "n3b", "w1", "b1", "w2", "b2"]
    per = {n: [] for n in names}
    scale = 1.0 / math.sqrt(dk)
    for i in range(N):
        lk = jax.random.split(keys[1 + i], 6)
        wq = lin(lk[0], d_model, d_model)
        wk = lin(lk[1], d_model, d_model)
        wv = lin(lk[2], d_model, d_model)
        wo = lin(lk[3], d_model, d_model)
        w1 = lin(lk[4], d_model, d_ff)
        w2 = lin(lk[5], d_ff, d_model)

        per["n1a"].append(jnp.ones((1, d_model), jnp.float32))
        per["n1b"].append(jnp.zeros((1, d_model), jnp.float32))
        per["n3a"].append(jnp.ones((1, d_model), jnp.float32))
        per["n3b"].append(jnp.zeros((1, d_model), jnp.float32))
        # Fused QKV weight [D, 3*D] with 1/sqrt(dk) folded into the Q slice ONCE at init
        # (head h == contiguous output slice [h*dk:(h+1)*dk], the PyTorch MHA convention).
        per["wqkv"].append(jnp.concatenate([wq * scale, wk, wv], axis=1)
                           .astype(jnp.bfloat16))
        per["bqkv"].append(jnp.zeros((1, 3 * d_model), jnp.float32))
        per["wo"].append(wo.astype(jnp.bfloat16))         # flat [H*dk, D], pre-transposed
        per["bo"].append(jnp.zeros((1, d_model), jnp.float32))
        per["w1"].append(w1.astype(jnp.bfloat16))
        per["b1"].append(jnp.zeros((1, d_ff), jnp.float32))
        per["w2"].append(w2.astype(jnp.bfloat16))
        per["b2"].append(jnp.zeros((1, d_model), jnp.float32))

    layers = {k: jnp.stack(v, axis=0) for k, v in per.items()}   # stacked along layer axis N
    return {"embed": embed, "layers": layers,
            "norm_a": jnp.ones((1, d_model), jnp.float32),
            "norm_b": jnp.zeros((1, d_model), jnp.float32)}


def positional_encoding(seq_len, d_model):
    pos = jnp.arange(seq_len, dtype=jnp.float32)[:, None]          # [S, 1]
    i = jnp.arange(0, d_model, 2, dtype=jnp.float32)[None, :]      # [1, D/2]
    div = jnp.power(10000.0, i / d_model)
    sin = jnp.sin(pos / div)
    cos = jnp.cos(pos / div)
    return jnp.stack([sin, cos], axis=-1).reshape(seq_len, d_model)  # interleaved sin/cos


def encoder_forward(src, mask, params, *, d_model, heads, n_layers):
    # Embedder + PositionalEncoder kept as plain-JAX glue (token gather).
    x = jnp.take(params["embed"], src, axis=0) * math.sqrt(d_model)   # [B, S, D]
    x = x + positional_encoding(src.shape[1], d_model)[None, :, :]
    # TODO(synk): dropout omitted (eval path, train=False -> identity).
    return run_encoder_stack(x, mask, params["layers"],
                             params["norm_a"], params["norm_b"],
                             heads=heads, n_layers=n_layers)


# ----------------------------- main -----------------------------

if __name__ == "__main__":
    key = jax.random.PRNGKey(0)
    k_tok, k_par = jax.random.split(key)

    B, S = 2, 8
    vocab_size, d_model, N, heads, d_ff = 50, 32, 2, 4, 64

    src = jax.random.randint(k_tok, (B, S), 0, vocab_size)
    mask = jnp.ones((S, S), jnp.float32)   # encoder src mask (1.0 = attend)
    params = init_params(k_par, vocab_size, d_model, N, heads, d_ff)

    out = encoder_forward(src, mask, params, d_model=d_model, heads=heads, n_layers=N)
    jax.block_until_ready(out)
    assert out.shape == (B, S, d_model)
    print("KERNEL_OK")
</pallas_src>

<mosaic_0001>
module attributes {stable_mosaic.version = 11 : i64} {
  func.func @encoder_stack_kernel(%arg0: i32, %arg1: memref<2x8x32xf32, #tpu.memory_space<vmem>>, %arg2: memref<8x8xf32, #tpu.memory_space<vmem>>, %arg3: memref<2x1x32xf32, #tpu.memory_space<vmem>>, %arg4: memref<2x1x32xf32, #tpu.memory_space<vmem>>, %arg5: memref<2x32x96xbf16, #tpu.memory_space<vmem>>, %arg6: memref<2x1x96xf32, #tpu.memory_space<vmem>>, %arg7: memref<2x32x32xbf16, #tpu.memory_space<vmem>>, %arg8: memref<2x1x32xf32, #tpu.memory_space<vmem>>, %arg9: memref<2x1x32xf32, #tpu.memory_space<vmem>>, %arg10: memref<2x1x32xf32, #tpu.memory_space<vmem>>, %arg11: memref<2x32x64xbf16, #tpu.memory_space<vmem>>, %arg12: memref<2x1x64xf32, #tpu.memory_space<vmem>>, %arg13: memref<2x64x32xbf16, #tpu.memory_space<vmem>>, %arg14: memref<2x1x32xf32, #tpu.memory_space<vmem>>, %arg15: memref<1x32xf32, #tpu.memory_space<vmem>>, %arg16: memref<1x32xf32, #tpu.memory_space<vmem>>, %arg17: memref<2x8x32xf32, #tpu.memory_space<vmem>>) attributes {dimension_semantics = [#tpu.dimension_semantics<parallel>], iteration_bounds = array<i64: 1>, scalar_prefetch = 0 : i64, scratch_operands = 0 : i64, tpu.core_type = #tpu.core_type<tc>, window_params = [{transform_indices = @transform_0, window_bounds = array<i64: 2, 8, 32>}, {pipeline_mode = #tpu.pipeline_mode<synchronous>, transform_indices = @transform_1, window_bounds = array<i64: 8, 8>}, {pipeline_mode = #tpu.pipeline_mode<synchronous>, transform_indices = @transform_2, window_bounds = array<i64: 2, 1, 32>}, {pipeline_mode = #tpu.pipeline_mode<synchronous>, transform_indices = @transform_3, window_bounds = array<i64: 2, 1, 32>}, {pipeline_mode = #tpu.pipeline_mode<synchronous>, transform_indices = @transform_4, window_bounds = array<i64: 2, 32, 96>}, {pipeline_mode = #tpu.pipeline_mode<synchronous>, transform_indices = @transform_5, window_bounds = array<i64: 2, 1, 96>}, {pipeline_mode = #tpu.pipeline_mode<synchronous>, transform_indices = @transform_6, window_bounds = array<i64: 2, 32, 32>}, {pipeline_mode = #tpu.pipeline_mode<synchronous>, transform_indices = @transform_7, window_bounds = array<i64: 2, 1, 32>}, {pipeline_mode = #tpu.pipeline_mode<synchronous>, transform_indices = @transform_8, window_bounds = array<i64: 2, 1, 32>}, {pipeline_mode = #tpu.pipeline_mode<synchronous>, transform_indices = @transform_9, window_bounds = array<i64: 2, 1, 32>}, {pipeline_mode = #tpu.pipeline_mode<synchronous>, transform_indices = @transform_10, window_bounds = array<i64: 2, 32, 64>}, {pipeline_mode = #tpu.pipeline_mode<synchronous>, transform_indices = @transform_11, window_bounds = array<i64: 2, 1, 64>}, {pipeline_mode = #tpu.pipeline_mode<synchronous>, transform_indices = @transform_12, window_bounds = array<i64: 2, 64, 32>}, {pipeline_mode = #tpu.pipeline_mode<synchronous>, transform_indices = @transform_13, window_bounds = array<i64: 2, 1, 32>}, {pipeline_mode = #tpu.pipeline_mode<synchronous>, transform_indices = @transform_14, window_bounds = array<i64: 1, 32>}, {pipeline_mode = #tpu.pipeline_mode<synchronous>, transform_indices = @transform_15, window_bounds = array<i64: 1, 32>}, {transform_indices = @transform_16, window_bounds = array<i64: 2, 8, 32>}]} {
    %c0 = arith.constant 0 : index
    %c0_0 = arith.constant 0 : index
    %c0_1 = arith.constant 0 : index
    %0 = vector.load %arg1[%c0, %c0_0, %c0_1] : memref<2x8x32xf32, #tpu.memory_space<vmem>>, vector<1x8x32xf32>
    %1 = vector.shape_cast %0 : vector<1x8x32xf32> to vector<8x32xf32>
    %c1 = arith.constant 1 : index
    %c0_2 = arith.constant 0 : index
    %c0_3 = arith.constant 0 : index
    %2 = vector.load %arg1[%c1, %c0_2, %c0_3] : memref<2x8x32xf32, #tpu.memory_space<vmem>>, vector<1x8x32xf32>
    %3 = vector.shape_cast %2 : vector<1x8x32xf32> to vector<8x32xf32>
    %4 = tpu.concatenate %1, %3 in 0 : vector<8x32xf32>, vector<8x32xf32> -> vector<16x32xf32>
    %c0_4 = arith.constant 0 : index
    %c0_5 = arith.constant 0 : index
    %5 = vector.load %arg2[%c0_4, %c0_5] : memref<8x8xf32, #tpu.memory_space<vmem>>, vector<8x8xf32>
    %cst = arith.constant 1.000000e+00 : f32
    %6 = vector.broadcast %cst : f32 to vector<8x8xf32>
    %7 = arith.subf %5, %6 : vector<8x8xf32>
    %cst_6 = arith.constant 1.000000e+09 : f32
    %8 = vector.broadcast %cst_6 : f32 to vector<8x8xf32>
    %9 = arith.mulf %7, %8 : vector<8x8xf32>
    %10 = vector.shape_cast %9 : vector<8x8xf32> to vector<1x8x8xf32>
    %c0_7 = arith.constant 0 : index
    %c0_8 = arith.constant 0 : index
    %c0_9 = arith.constant 0 : index
    %11 = vector.load %arg3[%c0_7, %c0_8, %c0_9] : memref<2x1x32xf32, #tpu.memory_space<vmem>>, vector<1x1x32xf32>
    %12 = vector.shape_cast %11 : vector<1x1x32xf32> to vector<1x32xf32>
    %c0_10 = arith.constant 0 : index
    %c0_11 = arith.constant 0 : index
    %c0_12 = arith.constant 0 : index
    %13 = vector.load %arg4[%c0_10, %c0_11, %c0_12] : memref<2x1x32xf32, #tpu.memory_space<vmem>>, vector<1x1x32xf32>
    %14 = vector.shape_cast %13 : vector<1x1x32xf32> to vector<1x32xf32>
    %cst_13 = arith.constant dense<0.000000e+00> : vector<16xf32>
    %15 = vector.multi_reduction <add>, %4, %cst_13 [1] : vector<16x32xf32> to vector<16xf32>
    %16 = vector.shape_cast %15 : vector<16xf32> to vector<16x1xf32>
    %cst_14 = arith.constant 3.200000e+01 : f32
    %17 = vector.broadcast %cst_14 : f32 to vector<16x1xf32>
    %18 = arith.divf %16, %17 : vector<16x1xf32>
    %19 = vector.broadcast %18 : vector<16x1xf32> to vector<16x32xf32>
    %20 = arith.subf %4, %19 : vector<16x32xf32>
    %21 = arith.mulf %20, %20 : vector<16x32xf32>
    %cst_15 = arith.constant dense<0.000000e+00> : vector<16xf32>
    %22 = vector.multi_reduction <add>, %21, %cst_15 [1] : vector<16x32xf32> to vector<16xf32>
    %23 = vector.shape_cast %22 : vector<16xf32> to vector<16x1xf32>
    %cst_16 = arith.constant 0.0322580636 : f32
    %24 = vector.broadcast %cst_16 : f32 to vector<16x1xf32>
    %25 = arith.mulf %23, %24 : vector<16x1xf32>
    %26 = math.sqrt %25 : vector<16x1xf32>
    %27 = vector.broadcast %12 : vector<1x32xf32> to vector<16x32xf32>
    %28 = arith.mulf %27, %20 : vector<16x32xf32>
    %cst_17 = arith.constant 9.99999997E-7 : f32
    %29 = vector.broadcast %cst_17 : f32 to vector<16x1xf32>
    %30 = arith.addf %26, %29 : vector<16x1xf32>
    %31 = vector.broadcast %30 : vector<16x1xf32> to vector<16x32xf32>
    %32 = arith.divf %28, %31 : vector<16x32xf32>
    %33 = vector.broadcast %14 : vector<1x32xf32> to vector<16x32xf32>
    %34 = arith.addf %32, %33 : vector<16x32xf32>
    %35 = arith.truncf %34 : vector<16x32xf32> to vector<16x32xbf16>
    %c0_18 = arith.constant 0 : index
    %c0_19 = arith.constant 0 : index
    %c0_20 = arith.constant 0 : index
    %36 = vector.load %arg5[%c0_18, %c0_19, %c0_20] : memref<2x32x96xbf16, #tpu.memory_space<vmem>>, vector<1x32x96xbf16>
    %37 = vector.shape_cast %36 : vector<1x32x96xbf16> to vector<32x96xbf16>
    %cst_21 = arith.constant dense<0.000000e+00> : vector<16x96xf32>
    %38 = tpu.matmul %35, %37, %cst_21 {dimension_numbers = #tpu.dot_dimension_numbers<[1], [0], [0], [1], [0, 0, 1, 1], [], []>} : vector<16x32xbf16>, vector<32x96xbf16>, vector<16x96xf32> -> vector<16x96xf32>
    %c0_22 = arith.constant 0 : index
    %c0_23 = arith.constant 0 : index
    %c0_24 = arith.constant 0 : index
    %39 = vector.load %arg6[%c0_22, %c0_23, %c0_24] : memref<2x1x96xf32, #tpu.memory_space<vmem>>, vector<1x1x96xf32>
    %40 = vector.shape_cast %39 : vector<1x1x96xf32> to vector<1x96xf32>
    %41 = vector.broadcast %40 : vector<1x96xf32> to vector<16x96xf32>
    %42 = arith.addf %38, %41 : vector<16x96xf32>
    %43 = vector.extract_strided_slice %42 {offsets = [0, 0], sizes = [8, 96], strides = [1, 1]} : vector<16x96xf32> to vector<8x96xf32>
    %44 = vector.extract_strided_slice %43 {offsets = [0, 0], sizes = [8, 8], strides = [1, 1]} : vector<8x96xf32> to vector<8x8xf32>
    %45 = vector.extract_strided_slice %43 {offsets = [0, 8], sizes = [8, 8], strides = [1, 1]} : vector<8x96xf32> to vector<8x8xf32>
    %46 = vector.extract_strided_slice %43 {offsets = [0, 16], sizes = [8, 8], strides = [1, 1]} : vector<8x96xf32> to vector<8x8xf32>
    %47 = vector.extract_strided_slice %43 {offsets = [0, 24], sizes = [8, 8], strides = [1, 1]} : vector<8x96xf32> to vector<8x8xf32>
    %48 = vector.extract_strided_slice %42 {offsets = [8, 0], sizes = [8, 96], strides = [1, 1]} : vector<16x96xf32> to vector<8x96xf32>
    %49 = vector.extract_strided_slice %48 {offsets = [0, 0], sizes = [8, 8], strides = [1, 1]} : vector<8x96xf32> to vector<8x8xf32>
    %50 = vector.extract_strided_slice %48 {offsets = [0, 8], sizes = [8, 8], strides = [1, 1]} : vector<8x96xf32> to vector<8x8xf32>
    %51 = vector.extract_strided_slice %48 {offsets = [0, 16], sizes = [8, 8], strides = [1, 1]} : vector<8x96xf32> to vector<8x8xf32>
    %52 = vector.extract_strided_slice %48 {offsets = [0, 24], sizes = [8, 8], strides = [1, 1]} : vector<8x96xf32> to vector<8x8xf32>
    %53 = vector.shape_cast %44 : vector<8x8xf32> to vector<1x8x8xf32>
    %54 = vector.shape_cast %45 : vector<8x8xf32> to vector<1x8x8xf32>
    %55 = vector.shape_cast %46 : vector<8x8xf32> to vector<1x8x8xf32>
    %56 = vector.shape_cast %47 : vector<8x8xf32> to vector<1x8x8xf32>
    %57 = vector.shape_cast %49 : vector<8x8xf32> to vector<1x8x8xf32>
    %58 = vector.shape_cast %50 : vector<8x8xf32> to vector<1x8x8xf32>
    %59 = vector.shape_cast %51 : vector<8x8xf32> to vector<1x8x8xf32>
    %60 = vector.shape_cast %52 : vector<8x8xf32> to vector<1x8x8xf32>
    %61 = tpu.concatenate %53, %54, %55, %56, %57, %58, %59, %60 in 0 : vector<1x8x8xf32>, vector<1x8x8xf32>, vector<1x8x8xf32>, vector<1x8x8xf32>, vector<1x8x8xf32>, vector<1x8x8xf32>, vector<1x8x8xf32>, vector<1x8x8xf32> -> vector<8x8x8xf32>
    %62 = arith.truncf %61 : vector<8x8x8xf32> to vector<8x8x8xbf16>
    %63 = vector.extract_strided_slice %42 {offsets = [0, 0], sizes = [8, 96], strides = [1, 1]} : vector<16x96xf32> to vector<8x96xf32>
    %64 = vector.extract_strided_slice %63 {offsets = [0, 32], sizes = [8, 8], strides = [1, 1]} : vector<8x96xf32> to vector<8x8xf32>
    %65 = vector.extract_strided_slice %63 {offsets = [0, 40], sizes = [8, 8], strides = [1, 1]} : vector<8x96xf32> to vector<8x8xf32>
    %66 = vector.extract_strided_slice %63 {offsets = [0, 48], sizes = [8, 8], strides = [1, 1]} : vector<8x96xf32> to vector<8x8xf32>
    %67 = vector.extract_strided_slice %63 {offsets = [0, 56], sizes = [8, 8], strides = [1, 1]} : vector<8x96xf32> to vector<8x8xf32>
    %68 = vector.extract_strided_slice %42 {offsets = [8, 0], sizes = [8, 96], strides = [1, 1]} : vector<16x96xf32> to vector<8x96xf32>
    %69 = vector.extract_strided_slice %68 {offsets = [0, 32], sizes = [8, 8], strides = [1, 1]} : vector<8x96xf32> to vector<8x8xf32>
    %70 = vector.extract_strided_slice %68 {offsets = [0, 40], sizes = [8, 8], strides = [1, 1]} : vector<8x96xf32> to vector<8x8xf32>
    %71 = vector.extract_strided_slice %68 {offsets = [0, 48], sizes = [8, 8], strides = [1, 1]} : vector<8x96xf32> to vector<8x8xf32>
    %72 = vector.extract_strided_slice %68 {offsets = [0, 56], sizes = [8, 8], strides = [1, 1]} : vector<8x96xf32> to vector<8x8xf32>
    %73 = vector.shape_cast %64 : vector<8x8xf32> to vector<1x8x8xf32>
    %74 = vector.shape_cast %65 : vector<8x8xf32> to vector<1x8x8xf32>
    %75 = vector.shape_cast %66 : vector<8x8xf32> to vector<1x8x8xf32>
    %76 = vector.shape_cast %67 : vector<8x8xf32> to vector<1x8x8xf32>
    %77 = vector.shape_cast %69 : vector<8x8xf32> to vector<1x8x8xf32>
    %78 = vector.shape_cast %70 : vector<8x8xf32> to vector<1x8x8xf32>
    %79 = vector.shape_cast %71 : vector<8x8xf32> to vector<1x8x8xf32>
    %80 = vector.shape_cast %72 : vector<8x8xf32> to vector<1x8x8xf32>
    %81 = tpu.concatenate %73, %74, %75, %76, %77, %78, %79, %80 in 0 : vector<1x8x8xf32>, vector<1x8x8xf32>, vector<1x8x8xf32>, vector<1x8x8xf32>, vector<1x8x8xf32>, vector<1x8x8xf32>, vector<1x8x8xf32>, vector<1x8x8xf32> -> vector<8x8x8xf32>
    %82 = arith.truncf %81 : vector<8x8x8xf32> to vector<8x8x8xbf16>
    %83 = vector.extract_strided_slice %42 {offsets = [0, 0], sizes = [8, 96], strides = [1, 1]} : vector<16x96xf32> to vector<8x96xf32>
    %84 = vector.extract_strided_slice %83 {offsets = [0, 64], sizes = [8, 8], strides = [1, 1]} : vector<8x96xf32> to vector<8x8xf32>
    %85 = vector.extract_strided_slice %83 {offsets = [0, 72], sizes = [8, 8], strides = [1, 1]} : vector<8x96xf32> to vector<8x8xf32>
    %86 = vector.extract_strided_slice %83 {offsets = [0, 80], sizes = [8, 8], strides = [1, 1]} : vector<8x96xf32> to vector<8x8xf32>
    %87 = vector.extract_strided_slice %83 {offsets = [0, 88], sizes = [8, 8], strides = [1, 1]} : vector<8x96xf32> to vector<8x8xf32>
    %88 = vector.extract_strided_slice %42 {offsets = [8, 0], sizes = [8, 96], strides = [1, 1]} : vector<16x96xf32> to vector<8x96xf32>
    %89 = vector.extract_strided_slice %88 {offsets = [0, 64], sizes = [8, 8], strides = [1, 1]} : vector<8x96xf32> to vector<8x8xf32>
    %90 = vector.extract_strided_slice %88 {offsets = [0, 72], sizes = [8, 8], strides = [1, 1]} : vector<8x96xf32> to vector<8x8xf32>
    %91 = vector.extract_strided_slice %88 {offsets = [0, 80], sizes = [8, 8], strides = [1, 1]} : vector<8x96xf32> to vector<8x8xf32>
    %92 = vector.extract_strided_slice %88 {offsets = [0, 88], sizes = [8, 8], strides = [1, 1]} : vector<8x96xf32> to vector<8x8xf32>
    %93 = vector.shape_cast %84 : vector<8x8xf32> to vector<1x8x8xf32>
    %94 = vector.shape_cast %85 : vector<8x8xf32> to vector<1x8x8xf32>
    %95 = vector.shape_cast %86 : vector<8x8xf32> to vector<1x8x8xf32>
    %96 = vector.shape_cast %87 : vector<8x8xf32> to vector<1x8x8xf32>
    %97 = vector.shape_cast %89 : vector<8x8xf32> to vector<1x8x8xf32>
    %98 = vector.shape_cast %90 : vector<8x8xf32> to vector<1x8x8xf32>
    %99 = vector.shape_cast %91 : vector<8x8xf32> to vector<1x8x8xf32>
    %100 = vector.shape_cast %92 : vector<8x8xf32> to vector<1x8x8xf32>
    %101 = tpu.concatenate %93, %94, %95, %96, %97, %98, %99, %100 in 0 : vector<1x8x8xf32>, vector<1x8x8xf32>, vector<1x8x8xf32>, vector<1x8x8xf32>, vector<1x8x8xf32>, vector<1x8x8xf32>, vector<1x8x8xf32>, vector<1x8x8xf32> -> vector<8x8x8xf32>
    %102 = arith.truncf %101 : vector<8x8x8xf32> to vector<8x8x8xbf16>
    %cst_25 = arith.constant dense<0.000000e+00> : vector<8x8x8xf32>
    %103 = tpu.matmul %62, %82, %cst_25 {dimension_numbers = #tpu.dot_dimension_numbers<[2], [2], [1], [1], [0, 0, 0, 1, 1, 1], [0], [0]>} : vector<8x8x8xbf16>, vector<8x8x8xbf16>, vector<8x8x8xf32> -> vector<8x8x8xf32>
    %104 = vector.broadcast %10 : vector<1x8x8xf32> to vector<8x8x8xf32>
    %105 = arith.addf %103, %104 : vector<8x8x8xf32>
    %cst_26 = arith.constant dense<0xFF800000> : vector<8x8xf32>
    %106 = vector.multi_reduction <maximumf>, %105, %cst_26 [2] : vector<8x8x8xf32> to vector<8x8xf32>
    %107 = vector.shape_cast %106 : vector<8x8xf32> to vector<8x8x1xf32>
    %108 = vector.broadcast %107 : vector<8x8x1xf32> to vector<8x8x8xf32>
    %109 = arith.subf %105, %108 : vector<8x8x8xf32>
    %110 = math.exp %109 : vector<8x8x8xf32>
    %cst_27 = arith.constant dense<0.000000e+00> : vector<8x8xf32>
    %111 = vector.multi_reduction <add>, %110, %cst_27 [2] : vector<8x8x8xf32> to vector<8x8xf32>
    %112 = vector.shape_cast %111 : vector<8x8xf32> to vector<8x8x1xf32>
    %113 = tpu.reciprocal %112 {approx = true} : vector<8x8x1xf32> -> vector<8x8x1xf32>
    %114 = vector.broadcast %113 : vector<8x8x1xf32> to vector<8x8x8xf32>
    %115 = arith.mulf %110, %114 : vector<8x8x8xf32>
    %116 = arith.truncf %115 : vector<8x8x8xf32> to vector<8x8x8xbf16>
    %cst_28 = arith.constant dense<0.000000e+00> : vector<8x8x8xf32>
    %117 = tpu.matmul %116, %102, %cst_28 {dimension_numbers = #tpu.dot_dimension_numbers<[2], [1], [1], [2], [0, 0, 0, 1, 1, 2], [0], [0]>} : vector<8x8x8xbf16>, vector<8x8x8xbf16>, vector<8x8x8xf32> -> vector<8x8x8xf32>
    %118 = vector.extract_strided_slice %117 {offsets = [0, 0, 0], sizes = [1, 8, 8], strides = [1, 1, 1]} : vector<8x8x8xf32> to vector<1x8x8xf32>
    %119 = vector.shape_cast %118 : vector<1x8x8xf32> to vector<8x8xf32>
    %120 = vector.extract_strided_slice %117 {offsets = [1, 0, 0], sizes = [1, 8, 8], strides = [1, 1, 1]} : vector<8x8x8xf32> to vector<1x8x8xf32>
    %121 = vector.shape_cast %120 : vector<1x8x8xf32> to vector<8x8xf32>
    %122 = vector.extract_strided_slice %117 {offsets = [2, 0, 0], sizes = [1, 8, 8], strides = [1, 1, 1]} : vector<8x8x8xf32> to vector<1x8x8xf32>
    %123 = vector.shape_cast %122 : vector<1x8x8xf32> to vector<8x8xf32>
    %124 = vector.extract_strided_slice %117 {offsets = [3, 0, 0], sizes = [1, 8, 8], strides = [1, 1, 1]} : vector<8x8x8xf32> to vector<1x8x8xf32>
    %125 = vector.shape_cast %124 : vector<1x8x8xf32> to vector<8x8xf32>
    %126 = tpu.concatenate %119, %121, %123, %125 in 1 : vector<8x8xf32>, vector<8x8xf32>, vector<8x8xf32>, vector<8x8xf32> -> vector<8x32xf32>
    %127 = vector.extract_strided_slice %117 {offsets = [4, 0, 0], sizes = [1, 8, 8], strides = [1, 1, 1]} : vector<8x8x8xf32> to vector<1x8x8xf32>
    %128 = vector.shape_cast %127 : vector<1x8x8xf32> to vector<8x8xf32>
    %129 = vector.extract_strided_slice %117 {offsets = [5, 0, 0], sizes = [1, 8, 8], strides = [1, 1, 1]} : vector<8x8x8xf32> to vector<1x8x8xf32>
    %130 = vector.shape_cast %129 : vector<1x8x8xf32> to vector<8x8xf32>
    %131 = vector.extract_strided_slice %117 {offsets = [6, 0, 0], sizes = [1, 8, 8], strides = [1, 1, 1]} : vector<8x8x8xf32> to vector<1x8x8xf32>
    %132 = vector.shape_cast %131 : vector<1x8x8xf32> to vector<8x8xf32>
    %133 = vector.extract_strided_slice %117 {offsets = [7, 0, 0], sizes = [1, 8, 8], strides = [1, 1, 1]} : vector<8x8x8xf32> to vector<1x8x8xf32>
    %134 = vector.shape_cast %133 : vector<1x8x8xf32> to vector<8x8xf32>
    %135 = tpu.concatenate %128, %130, %132, %134 in 1 : vector<8x8xf32>, vector<8x8xf32>, vector<8x8xf32>, vector<8x8xf32> -> vector<8x32xf32>
    %136 = tpu.concatenate %126, %135 in 0 : vector<8x32xf32>, vector<8x32xf32> -> vector<16x32xf32>
    %137 = arith.truncf %136 : vector<16x32xf32> to vector<16x32xbf16>
    %c0_29 = arith.constant 0 : index
    %c0_30 = arith.constant 0 : index
    %c0_31 = arith.constant 0 : index
    %138 = vector.load %arg7[%c0_29, %c0_30, %c0_31] : memref<2x32x32xbf16, #tpu.memory_space<vmem>>, vector<1x32x32xbf16>
    %139 = vector.shape_cast %138 : vector<1x32x32xbf16> to vector<32x32xbf16>
    %cst_32 = arith.constant dense<0.000000e+00> : vector<16x32xf32>
    %140 = tpu.matmul %137, %139, %cst_32 {dimension_numbers = #tpu.dot_dimension_numbers<[1], [0], [0], [1], [0, 0, 1, 1], [], []>} : vector<16x32xbf16>, vector<32x32xbf16>, vector<16x32xf32> -> vector<16x32xf32>
    %c0_33 = arith.constant 0 : index
    %c0_34 = arith.constant 0 : index
    %c0_35 = arith.constant 0 : index
    %141 = vector.load %arg8[%c0_33, %c0_34, %c0_35] : memref<2x1x32xf32, #tpu.memory_space<vmem>>, vector<1x1x32xf32>
    %142 = vector.shape_cast %141 : vector<1x1x32xf32> to vector<1x32xf32>
    %143 = vector.broadcast %142 : vector<1x32xf32> to vector<16x32xf32>
    %144 = arith.addf %140, %143 : vector<16x32xf32>
    %145 = arith.addf %4, %144 : vector<16x32xf32>
    %c0_36 = arith.constant 0 : index
    %c0_37 = arith.constant 0 : index
    %c0_38 = arith.constant 0 : index
    %146 = vector.load %arg9[%c0_36, %c0_37, %c0_38] : memref<2x1x32xf32, #tpu.memory_space<vmem>>, vector<1x1x32xf32>
    %147 = vector.shape_cast %146 : vector<1x1x32xf32> to vector<1x32xf32>
    %c0_39 = arith.constant 0 : index
    %c0_40 = arith.constant 0 : index
    %c0_41 = arith.constant 0 : index
    %148 = vector.load %arg10[%c0_39, %c0_40, %c0_41] : memref<2x1x32xf32, #tpu.memory_space<vmem>>, vector<1x1x32xf32>
    %149 = vector.shape_cast %148 : vector<1x1x32xf32> to vector<1x32xf32>
    %cst_42 = arith.constant dense<0.000000e+00> : vector<16xf32>
    %150 = vector.multi_reduction <add>, %145, %cst_42 [1] : vector<16x32xf32> to vector<16xf32>
    %151 = vector.shape_cast %150 : vector<16xf32> to vector<16x1xf32>
    %cst_43 = arith.constant 3.200000e+01 : f32
    %152 = vector.broadcast %cst_43 : f32 to vector<16x1xf32>
    %153 = arith.divf %151, %152 : vector<16x1xf32>
    %154 = vector.broadcast %153 : vector<16x1xf32> to vector<16x32xf32>
    %155 = arith.subf %145, %154 : vector<16x32xf32>
    %156 = arith.mulf %155, %155 : vector<16x32xf32>
    %cst_44 = arith.constant dense<0.000000e+00> : vector<16xf32>
    %157 = vector.multi_reduction <add>, %156, %cst_44 [1] : vector<16x32xf32> to vector<16xf32>
    %158 = vector.shape_cast %157 : vector<16xf32> to vector<16x1xf32>
    %cst_45 = arith.constant 0.0322580636 : f32
    %159 = vector.broadcast %cst_45 : f32 to vector<16x1xf32>
    %160 = arith.mulf %158, %159 : vector<16x1xf32>
    %161 = math.sqrt %160 : vector<16x1xf32>
    %162 = vector.broadcast %147 : vector<1x32xf32> to vector<16x32xf32>
    %163 = arith.mulf %162, %155 : vector<16x32xf32>
    %cst_46 = arith.constant 9.99999997E-7 : f32
    %164 = vector.broadcast %cst_46 : f32 to vector<16x1xf32>
    %165 = arith.addf %161, %164 : vector<16x1xf32>
    %166 = vector.broadcast %165 : vector<16x1xf32> to vector<16x32xf32>
    %167 = arith.divf %163, %166 : vector<16x32xf32>
    %168 = vector.broadcast %149 : vector<1x32xf32> to vector<16x32xf32>
    %169 = arith.addf %167, %168 : vector<16x32xf32>
    %170 = arith.truncf %169 : vector<16x32xf32> to vector<16x32xbf16>
    %c0_47 = arith.constant 0 : index
    %c0_48 = arith.constant 0 : index
    %c0_49 = arith.constant 0 : index
    %171 = vector.load %arg11[%c0_47, %c0_48, %c0_49] : memref<2x32x64xbf16, #tpu.memory_space<vmem>>, vector<1x32x64xbf16>
    %172 = vector.shape_cast %171 : vector<1x32x64xbf16> to vector<32x64xbf16>
    %cst_50 = arith.constant dense<0.000000e+00> : vector<16x64xf32>
    %173 = tpu.matmul %170, %172, %cst_50 {dimension_numbers = #tpu.dot_dimension_numbers<[1], [0], [0], [1], [0, 0, 1, 1], [], []>} : vector<16x32xbf16>, vector<32x64xbf16>, vector<16x64xf32> -> vector<16x64xf32>
    %c0_51 = arith.constant 0 : index
    %c0_52 = arith.constant 0 : index
    %c0_53 = arith.constant 0 : index
    %174 = vector.load %arg12[%c0_51, %c0_52, %c0_53] : memref<2x1x64xf32, #tpu.memory_space<vmem>>, vector<1x1x64xf32>
    %175 = vector.shape_cast %174 : vector<1x1x64xf32> to vector<1x64xf32>
    %176 = vector.broadcast %175 : vector<1x64xf32> to vector<16x64xf32>
    %177 = arith.addf %173, %176 : vector<16x64xf32>
    %cst_54 = arith.constant 0.000000e+00 : f32
    %178 = vector.broadcast %cst_54 : f32 to vector<16x64xf32>
    %179 = arith.maximumf %177, %178 : vector<16x64xf32>
    %180 = arith.truncf %179 : vector<16x64xf32> to vector<16x64xbf16>
    %c0_55 = arith.constant 0 : index
    %c0_56 = arith.constant 0 : index
    %c0_57 = arith.constant 0 : index
    %181 = vector.load %arg13[%c0_55, %c0_56, %c0_57] : memref<2x64x32xbf16, #tpu.memory_space<vmem>>, vector<1x64x32xbf16>
    %182 = vector.shape_cast %181 : vector<1x64x32xbf16> to vector<64x32xbf16>
    %cst_58 = arith.constant dense<0.000000e+00> : vector<16x32xf32>
    %183 = tpu.matmul %180, %182, %cst_58 {dimension_numbers = #tpu.dot_dimension_numbers<[1], [0], [0], [1], [0, 0, 1, 1], [], []>} : vector<16x64xbf16>, vector<64x32xbf16>, vector<16x32xf32> -> vector<16x32xf32>
    %c0_59 = arith.constant 0 : index
    %c0_60 = arith.constant 0 : index
    %c0_61 = arith.constant 0 : index
    %184 = vector.load %arg14[%c0_59, %c0_60, %c0_61] : memref<2x1x32xf32, #tpu.memory_space<vmem>>, vector<1x1x32xf32>
    %185 = vector.shape_cast %184 : vector<1x1x32xf32> to vector<1x32xf32>
    %186 = vector.broadcast %185 : vector<1x32xf32> to vector<16x32xf32>
    %187 = arith.addf %183, %186 : vector<16x32xf32>
    %188 = arith.addf %145, %187 : vector<16x32xf32>
    %c1_62 = arith.constant 1 : index
    %c0_63 = arith.constant 0 : index
    %c0_64 = arith.constant 0 : index
    %189 = vector.load %arg3[%c1_62, %c0_63, %c0_64] : memref<2x1x32xf32, #tpu.memory_space<vmem>>, vector<1x1x32xf32>
    %190 = vector.shape_cast %189 : vector<1x1x32xf32> to vector<1x32xf32>
    %c1_65 = arith.constant 1 : index
    %c0_66 = arith.constant 0 : index
    %c0_67 = arith.constant 0 : index
    %191 = vector.load %arg4[%c1_65, %c0_66, %c0_67] : memref<2x1x32xf32, #tpu.memory_space<vmem>>, vector<1x1x32xf32>
    %192 = vector.shape_cast %191 : vector<1x1x32xf32> to vector<1x32xf32>
    %cst_68 = arith.constant dense<0.000000e+00> : vector<16xf32>
    %193 = vector.multi_reduction <add>, %188, %cst_68 [1] : vector<16x32xf32> to vector<16xf32>
    %194 = vector.shape_cast %193 : vector<16xf32> to vector<16x1xf32>
    %cst_69 = arith.constant 3.200000e+01 : f32
    %195 = vector.broadcast %cst_69 : f32 to vector<16x1xf32>
    %196 = arith.divf %194, %195 : vector<16x1xf32>
    %197 = vector.broadcast %196 : vector<16x1xf32> to vector<16x32xf32>
    %198 = arith.subf %188, %197 : vector<16x32xf32>
    %199 = arith.mulf %198, %198 : vector<16x32xf32>
    %cst_70 = arith.constant dense<0.000000e+00> : vector<16xf32>
    %200 = vector.multi_reduction <add>, %199, %cst_70 [1] : vector<16x32xf32> to vector<16xf32>
    %201 = vector.shape_cast %200 : vector<16xf32> to vector<16x1xf32>
    %cst_71 = arith.constant 0.0322580636 : f32
    %202 = vector.broadcast %cst_71 : f32 to vector<16x1xf32>
    %203 = arith.mulf %201, %202 : vector<16x1xf32>
    %204 = math.sqrt %203 : vector<16x1xf32>
    %205 = vector.broadcast %190 : vector<1x32xf32> to vector<16x32xf32>
    %206 = arith.mulf %205, %198 : vector<16x32xf32>
    %cst_72 = arith.constant 9.99999997E-7 : f32
    %207 = vector.broadcast %cst_72 : f32 to vector<16x1xf32>
    %208 = arith.addf %204, %207 : vector<16x1xf32>
    %209 = vector.broadcast %208 : vector<16x1xf32> to vector<16x32xf32>
    %210 = arith.divf %206, %209 : vector<16x32xf32>
    %211 = vector.broadcast %192 : vector<1x32xf32> to vector<16x32xf32>
    %212 = arith.addf %210, %211 : vector<16x32xf32>
    %213 = arith.truncf %212 : vector<16x32xf32> to vector<16x32xbf16>
    %c1_73 = arith.constant 1 : index
    %c0_74 = arith.constant 0 : index
    %c0_75 = arith.constant 0 : index
    %214 = vector.load %arg5[%c1_73, %c0_74, %c0_75] : memref<2x32x96xbf16, #tpu.memory_space<vmem>>, vector<1x32x96xbf16>
    %215 = vector.shape_cast %214 : vector<1x32x96xbf16> to vector<32x96xbf16>
    %cst_76 = arith.constant dense<0.000000e+00> : vector<16x96xf32>
    %216 = tpu.matmul %213, %215, %cst_76 {dimension_numbers = #tpu.dot_dimension_numbers<[1], [0], [0], [1], [0, 0, 1, 1], [], []>} : vector<16x32xbf16>, vector<32x96xbf16>, vector<16x96xf32> -> vector<16x96xf32>
    %c1_77 = arith.constant 1 : index
    %c0_78 = arith.constant 0 : index
    %c0_79 = arith.constant 0 : index
    %217 = vector.load %arg6[%c1_77, %c0_78, %c0_79] : memref<2x1x96xf32, #tpu.memory_space<vmem>>, vector<1x1x96xf32>
    %218 = vector.shape_cast %217 : vector<1x1x96xf32> to vector<1x96xf32>
    %219 = vector.broadcast %218 : vector<1x96xf32> to vector<16x96xf32>
    %220 = arith.addf %216, %219 : vector<16x96xf32>
    %221 = vector.extract_strided_slice %220 {offsets = [0, 0], sizes = [8, 96], strides = [1, 1]} : vector<16x96xf32> to vector<8x96xf32>
    %222 = vector.extract_strided_slice %221 {offsets = [0, 0], sizes = [8, 8], strides = [1, 1]} : vector<8x96xf32> to vector<8x8xf32>
    %223 = vector.extract_strided_slice %221 {offsets = [0, 8], sizes = [8, 8], strides = [1, 1]} : vector<8x96xf32> to vector<8x8xf32>
    %224 = vector.extract_strided_slice %221 {offsets = [0, 16], sizes = [8, 8], strides = [1, 1]} : vector<8x96xf32> to vector<8x8xf32>
    %225 = vector.extract_strided_slice %221 {offsets = [0, 24], sizes = [8, 8], strides = [1, 1]} : vector<8x96xf32> to vector<8x8xf32>
    %226 = vector.extract_strided_slice %220 {offsets = [8, 0], sizes = [8, 96], strides = [1, 1]} : vector<16x96xf32> to vector<8x96xf32>
    %227 = vector.extract_strided_slice %226 {offsets = [0, 0], sizes = [8, 8], strides = [1, 1]} : vector<8x96xf32> to vector<8x8xf32>
    %228 = vector.extract_strided_slice %226 {offsets = [0, 8], sizes = [8, 8], strides = [1, 1]} : vector<8x96xf32> to vector<8x8xf32>
    %229 = vector.extract_strided_slice %226 {offsets = [0, 16], sizes = [8, 8], strides = [1, 1]} : vector<8x96xf32> to vector<8x8xf32>
    %230 = vector.extract_strided_slice %226 {offsets = [0, 24], sizes = [8, 8], strides = [1, 1]} : vector<8x96xf32> to vector<8x8xf32>
    %231 = vector.shape_cast %222 : vector<8x8xf32> to vector<1x8x8xf32>
    %232 = vector.shape_cast %223 : vector<8x8xf32> to vector<1x8x8xf32>
    %233 = vector.shape_cast %224 : vector<8x8xf32> to vector<1x8x8xf32>
    %234 = vector.shape_cast %225 : vector<8x8xf32> to vector<1x8x8xf32>
    %235 = vector.shape_cast %227 : vector<8x8xf32> to vector<1x8x8xf32>
    %236 = vector.shape_cast %228 : vector<8x8xf32> to vector<1x8x8xf32>
    %237 = vector.shape_cast %229 : vector<8x8xf32> to vector<1x8x8xf32>
    %238 = vector.shape_cast %230 : vector<8x8xf32> to vector<1x8x8xf32>
    %239 = tpu.concatenate %231, %232, %233, %234, %235, %236, %237, %238 in 0 : vector<1x8x8xf32>, vector<1x8x8xf32>, vector<1x8x8xf32>, vector<1x8x8xf32>, vector<1x8x8xf32>, vector<1x8x8xf32>, vector<1x8x8xf32>, vector<1x8x8xf32> -> vector<8x8x8xf32>
    %240 = arith.truncf %239 : vector<8x8x8xf32> to vector<8x8x8xbf16>
    %241 = vector.extract_strided_slice %220 {offsets = [0, 0], sizes = [8, 96], strides = [1, 1]} : vector<16x96xf32> to vector<8x96xf32>
    %242 = vector.extract_strided_slice %241 {offsets = [0, 32], sizes = [8, 8], strides = [1, 1]} : vector<8x96xf32> to vector<8x8xf32>
    %243 = vector.extract_strided_slice %241 {offsets = [0, 40], sizes = [8, 8], strides = [1, 1]} : vector<8x96xf32> to vector<8x8xf32>
    %244 = vector.extract_strided_slice %241 {offsets = [0, 48], sizes = [8, 8], strides = [1, 1]} : vector<8x96xf32> to vector<8x8xf32>
    %245 = vector.extract_strided_slice %241 {offsets = [0, 56], sizes = [8, 8], strides = [1, 1]} : vector<8x96xf32> to vector<8x8xf32>
    %246 = vector.extract_strided_slice %220 {offsets = [8, 0], sizes = [8, 96], strides = [1, 1]} : vector<16x96xf32> to vector<8x96xf32>
    %247 = vector.extract_strided_slice %246 {offsets = [0, 32], sizes = [8, 8], strides = [1, 1]} : vector<8x96xf32> to vector<8x8xf32>
    %248 = vector.extract_strided_slice %246 {offsets = [0, 40], sizes = [8, 8], strides = [1, 1]} : vector<8x96xf32> to vector<8x8xf32>
    %249 = vector.extract_strided_slice %246 {offsets = [0, 48], sizes = [8, 8], strides = [1, 1]} : vector<8x96xf32> to vector<8x8xf32>
    %250 = vector.extract_strided_slice %246 {offsets = [0, 56], sizes = [8, 8], strides = [1, 1]} : vector<8x96xf32> to vector<8x8xf32>
    %251 = vector.shape_cast %242 : vector<8x8xf32> to vector<1x8x8xf32>
    %252 = vector.shape_cast %243 : vector<8x8xf32> to vector<1x8x8xf32>
    %253 = vector.shape_cast %244 : vector<8x8xf32> to vector<1x8x8xf32>
    %254 = vector.shape_cast %245 : vector<8x8xf32> to vector<1x8x8xf32>
    %255 = vector.shape_cast %247 : vector<8x8xf32> to vector<1x8x8xf32>
    %256 = vector.shape_cast %248 : vector<8x8xf32> to vector<1x8x8xf32>
    %257 = vector.shape_cast %249 : vector<8x8xf32> to vector<1x8x8xf32>
    %258 = vector.shape_cast %250 : vector<8x8xf32> to vector<1x8x8xf32>
    %259 = tpu.concatenate %251, %252, %253, %254, %255, %256, %257, %258 in 0 : vector<1x8x8xf32>, vector<1x8x8xf32>, vector<1x8x8xf32>, vector<1x8x8xf32>, vector<1x8x8xf32>, vector<1x8x8xf32>, vector<1x8x8xf32>, vector<1x8x8xf32> -> vector<8x8x8xf32>
    %260 = arith.truncf %259 : vector<8x8x8xf32> to vector<8x8x8xbf16>
    %261 = vector.extract_strided_slice %220 {offsets = [0, 0], sizes = [8, 96], strides = [1, 1]} : vector<16x96xf32> to vector<8x96xf32>
    %262 = vector.extract_strided_slice %261 {offsets = [0, 64], sizes = [8, 8], strides = [1, 1]} : vector<8x96xf32> to vector<8x8xf32>
    %263 = vector.extract_strided_slice %261 {offsets = [0, 72], sizes = [8, 8], strides = [1, 1]} : vector<8x96xf32> to vector<8x8xf32>
    %264 = vector.extract_strided_slice %261 {offsets = [0, 80], sizes = [8, 8], strides = [1, 1]} : vector<8x96xf32> to vector<8x8xf32>
    %265 = vector.extract_strided_slice %261 {offsets = [0, 88], sizes = [8, 8], strides = [1, 1]} : vector<8x96xf32> to vector<8x8xf32>
    %266 = vector.extract_strided_slice %220 {offsets = [8, 0], sizes = [8, 96], strides = [1, 1]} : vector<16x96xf32> to vector<8x96xf32>
    %267 = vector.extract_strided_slice %266 {offsets = [0, 64], sizes = [8, 8], strides = [1, 1]} : vector<8x96xf32> to vector<8x8xf32>
    %268 = vector.extract_strided_slice %266 {offsets = [0, 72], sizes = [8, 8], strides = [1, 1]} : vector<8x96xf32> to vector<8x8xf32>
    %269 = vector.extract_strided_slice %266 {offsets = [0, 80], sizes = [8, 8], strides = [1, 1]} : vector<8x96xf32> to vector<8x8xf32>
    %270 = vector.extract_strided_slice %266 {offsets = [0, 88], sizes = [8, 8], strides = [1, 1]} : vector<8x96xf32> to vector<8x8xf32>
    %271 = vector.shape_cast %262 : vector<8x8xf32> to vector<1x8x8xf32>
    %272 = vector.shape_cast %263 : vector<8x8xf32> to vector<1x8x8xf32>
    %273 = vector.shape_cast %264 : vector<8x8xf32> to vector<1x8x8xf32>
    %274 = vector.shape_cast %265 : vector<8x8xf32> to vector<1x8x8xf32>
    %275 = vector.shape_cast %267 : vector<8x8xf32> to vector<1x8x8xf32>
    %276 = vector.shape_cast %268 : vector<8x8xf32> to vector<1x8x8xf32>
    %277 = vector.shape_cast %269 : vector<8x8xf32> to vector<1x8x8xf32>
    %278 = vector.shape_cast %270 : vector<8x8xf32> to vector<1x8x8xf32>
    %279 = tpu.concatenate %271, %272, %273, %274, %275, %276, %277, %278 in 0 : vector<1x8x8xf32>, vector<1x8x8xf32>, vector<1x8x8xf32>, vector<1x8x8xf32>, vector<1x8x8xf32>, vector<1x8x8xf32>, vector<1x8x8xf32>, vector<1x8x8xf32> -> vector<8x8x8xf32>
    %280 = arith.truncf %279 : vector<8x8x8xf32> to vector<8x8x8xbf16>
    %cst_80 = arith.constant dense<0.000000e+00> : vector<8x8x8xf32>
    %281 = tpu.matmul %240, %260, %cst_80 {dimension_numbers = #tpu.dot_dimension_numbers<[2], [2], [1], [1], [0, 0, 0, 1, 1, 1], [0], [0]>} : vector<8x8x8xbf16>, vector<8x8x8xbf16>, vector<8x8x8xf32> -> vector<8x8x8xf32>
    %282 = vector.broadcast %10 : vector<1x8x8xf32> to vector<8x8x8xf32>
    %283 = arith.addf %281, %282 : vector<8x8x8xf32>
    %cst_81 = arith.constant dense<0xFF800000> : vector<8x8xf32>
    %284 = vector.multi_reduction <maximumf>, %283, %cst_81 [2] : vector<8x8x8xf32> to vector<8x8xf32>
    %285 = vector.shape_cast %284 : vector<8x8xf32> to vector<8x8x1xf32>
    %286 = vector.broadcast %285 : vector<8x8x1xf32> to vector<8x8x8xf32>
    %287 = arith.subf %283, %286 : vector<8x8x8xf32>
    %288 = math.exp %287 : vector<8x8x8xf32>
    %cst_82 = arith.constant dense<0.000000e+00> : vector<8x8xf32>
    %289 = vector.multi_reduction <add>, %288, %cst_82 [2] : vector<8x8x8xf32> to vector<8x8xf32>
    %290 = vector.shape_cast %289 : vector<8x8xf32> to vector<8x8x1xf32>
    %291 = tpu.reciprocal %290 {approx = true} : vector<8x8x1xf32> -> vector<8x8x1xf32>
    %292 = vector.broadcast %291 : vector<8x8x1xf32> to vector<8x8x8xf32>
    %293 = arith.mulf %288, %292 : vector<8x8x8xf32>
    %294 = arith.truncf %293 : vector<8x8x8xf32> to vector<8x8x8xbf16>
    %cst_83 = arith.constant dense<0.000000e+00> : vector<8x8x8xf32>
    %295 = tpu.matmul %294, %280, %cst_83 {dimension_numbers = #tpu.dot_dimension_numbers<[2], [1], [1], [2], [0, 0, 0, 1, 1, 2], [0], [0]>} : vector<8x8x8xbf16>, vector<8x8x8xbf16>, vector<8x8x8xf32> -> vector<8x8x8xf32>
    %296 = vector.extract_strided_slice %295 {offsets = [0, 0, 0], sizes = [1, 8, 8], strides = [1, 1, 1]} : vector<8x8x8xf32> to vector<1x8x8xf32>
    %297 = vector.shape_cast %296 : vector<1x8x8xf32> to vector<8x8xf32>
    %298 = vector.extract_strided_slice %295 {offsets = [1, 0, 0], sizes = [1, 8, 8], strides = [1, 1, 1]} : vector<8x8x8xf32> to vector<1x8x8xf32>
    %299 = vector.shape_cast %298 : vector<1x8x8xf32> to vector<8x8xf32>
    %300 = vector.extract_strided_slice %295 {offsets = [2, 0, 0], sizes = [1, 8, 8], strides = [1, 1, 1]} : vector<8x8x8xf32> to vector<1x8x8xf32>
    %301 = vector.shape_cast %300 : vector<1x8x8xf32> to vector<8x8xf32>
    %302 = vector.extract_strided_slice %295 {offsets = [3, 0, 0], sizes = [1, 8, 8], strides = [1, 1, 1]} : vector<8x8x8xf32> to vector<1x8x8xf32>
    %303 = vector.shape_cast %302 : vector<1x8x8xf32> to vector<8x8xf32>
    %304 = tpu.concatenate %297, %299, %301, %303 in 1 : vector<8x8xf32>, vector<8x8xf32>, vector<8x8xf32>, vector<8x8xf32> -> vector<8x32xf32>
    %305 = vector.extract_strided_slice %295 {offsets = [4, 0, 0], sizes = [1, 8, 8], strides = [1, 1, 1]} : vector<8x8x8xf32> to vector<1x8x8xf32>
    %306 = vector.shape_cast %305 : vector<1x8x8xf32> to vector<8x8xf32>
    %307 = vector.extract_strided_slice %295 {offsets = [5, 0, 0], sizes = [1, 8, 8], strides = [1, 1, 1]} : vector<8x8x8xf32> to vector<1x8x8xf32>
    %308 = vector.shape_cast %307 : vector<1x8x8xf32> to vector<8x8xf32>
    %309 = vector.extract_strided_slice %295 {offsets = [6, 0, 0], sizes = [1, 8, 8], strides = [1, 1, 1]} : vector<8x8x8xf32> to vector<1x8x8xf32>
    %310 = vector.shape_cast %309 : vector<1x8x8xf32> to vector<8x8xf32>
    %311 = vector.extract_strided_slice %295 {offsets = [7, 0, 0], sizes = [1, 8, 8], strides = [1, 1, 1]} : vector<8x8x8xf32> to vector<1x8x8xf32>
    %312 = vector.shape_cast %311 : vector<1x8x8xf32> to vector<8x8xf32>
    %313 = tpu.concatenate %306, %308, %310, %312 in 1 : vector<8x8xf32>, vector<8x8xf32>, vector<8x8xf32>, vector<8x8xf32> -> vector<8x32xf32>
    %314 = tpu.concatenate %304, %313 in 0 : vector<8x32xf32>, vector<8x32xf32> -> vector<16x32xf32>
    %315 = arith.truncf %314 : vector<16x32xf32> to vector<16x32xbf16>
    %c1_84 = arith.constant 1 : index
    %c0_85 = arith.constant 0 : index
    %c0_86 = arith.constant 0 : index
    %316 = vector.load %arg7[%c1_84, %c0_85, %c0_86] : memref<2x32x32xbf16, #tpu.memory_space<vmem>>, vector<1x32x32xbf16>
    %317 = vector.shape_cast %316 : vector<1x32x32xbf16> to vector<32x32xbf16>
    %cst_87 = arith.constant dense<0.000000e+00> : vector<16x32xf32>
    %318 = tpu.matmul %315, %317, %cst_87 {dimension_numbers = #tpu.dot_dimension_numbers<[1], [0], [0], [1], [0, 0, 1, 1], [], []>} : vector<16x32xbf16>, vector<32x32xbf16>, vector<16x32xf32> -> vector<16x32xf32>
    %c1_88 = arith.constant 1 : index
    %c0_89 = arith.constant 0 : index
    %c0_90 = arith.constant 0 : index
    %319 = vector.load %arg8[%c1_88, %c0_89, %c0_90] : memref<2x1x32xf32, #tpu.memory_space<vmem>>, vector<1x1x32xf32>
    %320 = vector.shape_cast %319 : vector<1x1x32xf32> to vector<1x32xf32>
    %321 = vector.broadcast %320 : vector<1x32xf32> to vector<16x32xf32>
    %322 = arith.addf %318, %321 : vector<16x32xf32>
    %323 = arith.addf %188, %322 : vector<16x32xf32>
    %c1_91 = arith.constant 1 : index
    %c0_92 = arith.constant 0 : index
    %c0_93 = arith.constant 0 : index
    %324 = vector.load %arg9[%c1_91, %c0_92, %c0_93] : memref<2x1x32xf32, #tpu.memory_space<vmem>>, vector<1x1x32xf32>
    %325 = vector.shape_cast %324 : vector<1x1x32xf32> to vector<1x32xf32>
    %c1_94 = arith.constant 1 : index
    %c0_95 = arith.constant 0 : index
    %c0_96 = arith.constant 0 : index
    %326 = vector.load %arg10[%c1_94, %c0_95, %c0_96] : memref<2x1x32xf32, #tpu.memory_space<vmem>>, vector<1x1x32xf32>
    %327 = vector.shape_cast %326 : vector<1x1x32xf32> to vector<1x32xf32>
    %cst_97 = arith.constant dense<0.000000e+00> : vector<16xf32>
    %328 = vector.multi_reduction <add>, %323, %cst_97 [1] : vector<16x32xf32> to vector<16xf32>
    %329 = vector.shape_cast %328 : vector<16xf32> to vector<16x1xf32>
    %cst_98 = arith.constant 3.200000e+01 : f32
    %330 = vector.broadcast %cst_98 : f32 to vector<16x1xf32>
    %331 = arith.divf %329, %330 : vector<16x1xf32>
    %332 = vector.broadcast %331 : vector<16x1xf32> to vector<16x32xf32>
    %333 = arith.subf %323, %332 : vector<16x32xf32>
    %334 = arith.mulf %333, %333 : vector<16x32xf32>
    %cst_99 = arith.constant dense<0.000000e+00> : vector<16xf32>
    %335 = vector.multi_reduction <add>, %334, %cst_99 [1] : vector<16x32xf32> to vector<16xf32>
    %336 = vector.shape_cast %335 : vector<16xf32> to vector<16x1xf32>
    %cst_100 = arith.constant 0.0322580636 : f32
    %337 = vector.broadcast %cst_100 : f32 to vector<16x1xf32>
    %338 = arith.mulf %336, %337 : vector<16x1xf32>
    %339 = math.sqrt %338 : vector<16x1xf32>
    %340 = vector.broadcast %325 : vector<1x32xf32> to vector<16x32xf32>
    %341 = arith.mulf %340, %333 : vector<16x32xf32>
    %cst_101 = arith.constant 9.99999997E-7 : f32
    %342 = vector.broadcast %cst_101 : f32 to vector<16x1xf32>
    %343 = arith.addf %339, %342 : vector<16x1xf32>
    %344 = vector.broadcast %343 : vector<16x1xf32> to vector<16x32xf32>
    %345 = arith.divf %341, %344 : vector<16x32xf32>
    %346 = vector.broadcast %327 : vector<1x32xf32> to vector<16x32xf32>
    %347 = arith.addf %345, %346 : vector<16x32xf32>
    %348 = arith.truncf %347 : vector<16x32xf32> to vector<16x32xbf16>
    %c1_102 = arith.constant 1 : index
    %c0_103 = arith.constant 0 : index
    %c0_104 = arith.constant 0 : index
    %349 = vector.load %arg11[%c1_102, %c0_103, %c0_104] : memref<2x32x64xbf16, #tpu.memory_space<vmem>>, vector<1x32x64xbf16>
    %350 = vector.shape_cast %349 : vector<1x32x64xbf16> to vector<32x64xbf16>
    %cst_105 = arith.constant dense<0.000000e+00> : vector<16x64xf32>
    %351 = tpu.matmul %348, %350, %cst_105 {dimension_numbers = #tpu.dot_dimension_numbers<[1], [0], [0], [1], [0, 0, 1, 1], [], []>} : vector<16x32xbf16>, vector<32x64xbf16>, vector<16x64xf32> -> vector<16x64xf32>
    %c1_106 = arith.constant 1 : index
    %c0_107 = arith.constant 0 : index
    %c0_108 = arith.constant 0 : index
    %352 = vector.load %arg12[%c1_106, %c0_107, %c0_108] : memref<2x1x64xf32, #tpu.memory_space<vmem>>, vector<1x1x64xf32>
    %353 = vector.shape_cast %352 : vector<1x1x64xf32> to vector<1x64xf32>
    %354 = vector.broadcast %353 : vector<1x64xf32> to vector<16x64xf32>
    %355 = arith.addf %351, %354 : vector<16x64xf32>
    %cst_109 = arith.constant 0.000000e+00 : f32
    %356 = vector.broadcast %cst_109 : f32 to vector<16x64xf32>
    %357 = arith.maximumf %355, %356 : vector<16x64xf32>
    %358 = arith.truncf %357 : vector<16x64xf32> to vector<16x64xbf16>
    %c1_110 = arith.constant 1 : index
    %c0_111 = arith.constant 0 : index
    %c0_112 = arith.constant 0 : index
    %359 = vector.load %arg13[%c1_110, %c0_111, %c0_112] : memref<2x64x32xbf16, #tpu.memory_space<vmem>>, vector<1x64x32xbf16>
    %360 = vector.shape_cast %359 : vector<1x64x32xbf16> to vector<64x32xbf16>
    %cst_113 = arith.constant dense<0.000000e+00> : vector<16x32xf32>
    %361 = tpu.matmul %358, %360, %cst_113 {dimension_numbers = #tpu.dot_dimension_numbers<[1], [0], [0], [1], [0, 0, 1, 1], [], []>} : vector<16x64xbf16>, vector<64x32xbf16>, vector<16x32xf32> -> vector<16x32xf32>
    %c1_114 = arith.constant 1 : index
    %c0_115 = arith.constant 0 : index
    %c0_116 = arith.constant 0 : index
    %362 = vector.load %arg14[%c1_114, %c0_115, %c0_116] : memref<2x1x32xf32, #tpu.memory_space<vmem>>, vector<1x1x32xf32>
    %363 = vector.shape_cast %362 : vector<1x1x32xf32> to vector<1x32xf32>
    %364 = vector.broadcast %363 : vector<1x32xf32> to vector<16x32xf32>
    %365 = arith.addf %361, %364 : vector<16x32xf32>
    %366 = arith.addf %323, %365 : vector<16x32xf32>
    %c0_117 = arith.constant 0 : index
    %c0_118 = arith.constant 0 : index
    %367 = vector.load %arg15[%c0_117, %c0_118] : memref<1x32xf32, #tpu.memory_space<vmem>>, vector<1x32xf32>
    %c0_119 = arith.constant 0 : index
    %c0_120 = arith.constant 0 : index
    %368 = vector.load %arg16[%c0_119, %c0_120] : memref<1x32xf32, #tpu.memory_space<vmem>>, vector<1x32xf32>
    %cst_121 = arith.constant dense<0.000000e+00> : vector<16xf32>
    %369 = vector.multi_reduction <add>, %366, %cst_121 [1] : vector<16x32xf32> to vector<16xf32>
    %370 = vector.shape_cast %369 : vector<16xf32> to vector<16x1xf32>
    %cst_122 = arith.constant 3.200000e+01 : f32
    %371 = vector.broadcast %cst_122 : f32 to vector<16x1xf32>
    %372 = arith.divf %370, %371 : vector<16x1xf32>
    %373 = vector.broadcast %372 : vector<16x1xf32> to vector<16x32xf32>
    %374 = arith.subf %366, %373 : vector<16x32xf32>
    %375 = arith.mulf %374, %374 : vector<16x32xf32>
    %cst_123 = arith.constant dense<0.000000e+00> : vector<16xf32>
    %376 = vector.multi_reduction <add>, %375, %cst_123 [1] : vector<16x32xf32> to vector<16xf32>
    %377 = vector.shape_cast %376 : vector<16xf32> to vector<16x1xf32>
    %cst_124 = arith.constant 0.0322580636 : f32
    %378 = vector.broadcast %cst_124 : f32 to vector<16x1xf32>
    %379 = arith.mulf %377, %378 : vector<16x1xf32>
    %380 = math.sqrt %379 : vector<16x1xf32>
    %381 = vector.broadcast %367 : vector<1x32xf32> to vector<16x32xf32>
    %382 = arith.mulf %381, %374 : vector<16x32xf32>
    %cst_125 = arith.constant 9.99999997E-7 : f32
    %383 = vector.broadcast %cst_125 : f32 to vector<16x1xf32>
    %384 = arith.addf %380, %383 : vector<16x1xf32>
    %385 = vector.broadcast %384 : vector<16x1xf32> to vector<16x32xf32>
    %386 = arith.divf %382, %385 : vector<16x32xf32>
    %387 = vector.broadcast %368 : vector<1x32xf32> to vector<16x32xf32>
    %388 = arith.addf %386, %387 : vector<16x32xf32>
    %389 = vector.extract_strided_slice %388 {offsets = [0, 0], sizes = [8, 32], strides = [1, 1]} : vector<16x32xf32> to vector<8x32xf32>
    %c0_126 = arith.constant 0 : index
    %c0_127 = arith.constant 0 : index
    %c0_128 = arith.constant 0 : index
    %390 = vector.load %arg17[%c0_126, %c0_127, %c0_128] : memref<2x8x32xf32, #tpu.memory_space<vmem>>, vector<1x8x32xf32>
    %391 = vector.shape_cast %390 : vector<1x8x32xf32> to vector<8x32xf32>
    %392 = vector.shape_cast %389 : vector<8x32xf32> to vector<1x8x32xf32>
    tpu.vector_store %arg17[%c0_126, %c0_127, %c0_128], %392 {strides = array<i32>} : memref<2x8x32xf32, #tpu.memory_space<vmem>>, vector<1x8x32xf32>,
    %393 = vector.extract_strided_slice %388 {offsets = [8, 0], sizes = [8, 32], strides = [1, 1]} : vector<16x32xf32> to vector<8x32xf32>
    %c1_129 = arith.constant 1 : index
    %c0_130 = arith.constant 0 : index
    %c0_131 = arith.constant 0 : index
    %394 = vector.load %arg17[%c1_129, %c0_130, %c0_131] : memref<2x8x32xf32, #tpu.memory_space<vmem>>, vector<1x8x32xf32>
    %395 = vector.shape_cast %394 : vector<1x8x32xf32> to vector<8x32xf32>
    %396 = vector.shape_cast %393 : vector<8x32xf32> to vector<1x8x32xf32>
    tpu.vector_store %arg17[%c1_129, %c0_130, %c0_131], %396 {strides = array<i32>} : memref<2x8x32xf32, #tpu.memory_space<vmem>>, vector<1x8x32xf32>,
    return
  }
  func.func @transform_0(%arg0: i32) -> (i32, i32, i32) {
    %c0_i32 = arith.constant 0 : i32
    %c0_i32_0 = arith.constant 0 : i32
    %c0_i32_1 = arith.constant 0 : i32
    return %arg0, %c0_i32, %c0_i32_0 : i32, i32, i32
  }
  func.func @transform_1(%arg0: i32) -> (i32, i32) {
    %c0_i32 = arith.constant 0 : i32
    %c0_i32_0 = arith.constant 0 : i32
    %c0_i32_1 = arith.constant 0 : i32
    return %c0_i32, %c0_i32_0 : i32, i32
  }
  func.func @transform_2(%arg0: i32) -> (i32, i32, i32) {
    %c0_i32 = arith.constant 0 : i32
    %c0_i32_0 = arith.constant 0 : i32
    %c0_i32_1 = arith.constant 0 : i32
    %c0_i32_2 = arith.constant 0 : i32
    return %c0_i32, %c0_i32_0, %c0_i32_1 : i32, i32, i32
  }
  func.func @transform_3(%arg0: i32) -> (i32, i32, i32) {
    %c0_i32 = arith.constant 0 : i32
    %c0_i32_0 = arith.constant 0 : i32
    %c0_i32_1 = arith.constant 0 : i32
    %c0_i32_2 = arith.constant 0 : i32
    return %c0_i32, %c0_i32_0, %c0_i32_1 : i32, i32, i32
  }
  func.func @transform_4(%arg0: i32) -> (i32, i32, i32) {
    %c0_i32 = arith.constant 0 : i32
    %c0_i32_0 = arith.constant 0 : i32
    %c0_i32_1 = arith.constant 0 : i32
    %c0_i32_2 = arith.constant 0 : i32
    return %c0_i32, %c0_i32_0, %c0_i32_1 : i32, i32, i32
  }
  func.func @transform_5(%arg0: i32) -> (i32, i32, i32) {
    %c0_i32 = arith.constant 0 : i32
    %c0_i32_0 = arith.constant 0 : i32
    %c0_i32_1 = arith.constant 0 : i32
    %c0_i32_2 = arith.constant 0 : i32
    return %c0_i32, %c0_i32_0, %c0_i32_1 : i32, i32, i32
  }
  func.func @transform_6(%arg0: i32) -> (i32, i32, i32) {
    %c0_i32 = arith.constant 0 : i32
    %c0_i32_0 = arith.constant 0 : i32
    %c0_i32_1 = arith.constant 0 : i32
    %c0_i32_2 = arith.constant 0 : i32
    return %c0_i32, %c0_i32_0, %c0_i32_1 : i32, i32, i32
  }
  func.func @transform_7(%arg0: i32) -> (i32, i32, i32) {
    %c0_i32 = arith.constant 0 : i32
    %c0_i32_0 = arith.constant 0 : i32
    %c0_i32_1 = arith.constant 0 : i32
    %c0_i32_2 = arith.constant 0 : i32
    return %c0_i32, %c0_i32_0, %c0_i32_1 : i32, i32, i32
  }
  func.func @transform_8(%arg0: i32) -> (i32, i32, i32) {
    %c0_i32 = arith.constant 0 : i32
    %c0_i32_0 = arith.constant 0 : i32
    %c0_i32_1 = arith.constant 0 : i32
    %c0_i32_2 = arith.constant 0 : i32
    return %c0_i32, %c0_i32_0, %c0_i32_1 : i32, i32, i32
  }
  func.func @transform_9(%arg0: i32) -> (i32, i32, i32) {
    %c0_i32 = arith.constant 0 : i32
    %c0_i32_0 = arith.constant 0 : i32
    %c0_i32_1 = arith.constant 0 : i32
    %c0_i32_2 = arith.constant 0 : i32
    return %c0_i32, %c0_i32_0, %c0_i32_1 : i32, i32, i32
  }
  func.func @transform_10(%arg0: i32) -> (i32, i32, i32) {
    %c0_i32 = arith.constant 0 : i32
    %c0_i32_0 = arith.constant 0 : i32
    %c0_i32_1 = arith.constant 0 : i32
    %c0_i32_2 = arith.constant 0 : i32
    return %c0_i32, %c0_i32_0, %c0_i32_1 : i32, i32, i32
  }
  func.func @transform_11(%arg0: i32) -> (i32, i32, i32) {
    %c0_i32 = arith.constant 0 : i32
    %c0_i32_0 = arith.constant 0 : i32
    %c0_i32_1 = arith.constant 0 : i32
    %c0_i32_2 = arith.constant 0 : i32
    return %c0_i32, %c0_i32_0, %c0_i32_1 : i32, i32, i32
  }
  func.func @transform_12(%arg0: i32) -> (i32, i32, i32) {
    %c0_i32 = arith.constant 0 : i32
    %c0_i32_0 = arith.constant 0 : i32
    %c0_i32_1 = arith.constant 0 : i32
    %c0_i32_2 = arith.constant 0 : i32
    return %c0_i32, %c0_i32_0, %c0_i32_1 : i32, i32, i32
  }
  func.func @transform_13(%arg0: i32) -> (i32, i32, i32) {
    %c0_i32 = arith.constant 0 : i32
    %c0_i32_0 = arith.constant 0 : i32
    %c0_i32_1 = arith.constant 0 : i32
    %c0_i32_2 = arith.constant 0 : i32
    return %c0_i32, %c0_i32_0, %c0_i32_1 : i32, i32, i32
  }
  func.func @transform_14(%arg0: i32) -> (i32, i32) {
    %c0_i32 = arith.constant 0 : i32
    %c0_i32_0 = arith.constant 0 : i32
    %c0_i32_1 = arith.constant 0 : i32
    return %c0_i32, %c0_i32_0 : i32, i32
  }
  func.func @transform_15(%arg0: i32) -> (i32, i32) {
    %c0_i32 = arith.constant 0 : i32
    %c0_i32_0 = arith.constant 0 : i32
    %c0_i32_1 = arith.constant 0 : i32
    return %c0_i32, %c0_i32_0 : i32, i32
  }
  func.func @transform_16(%arg0: i32) -> (i32, i32, i32) {
    %c0_i32 = arith.constant 0 : i32
    %c0_i32_0 = arith.constant 0 : i32
    %c0_i32_1 = arith.constant 0 : i32
    return %arg0, %c0_i32, %c0_i32_0 : i32, i32, i32
  }
}

</mosaic_0001>

<bundles_post_ra>
// kernel: tpu_custom_call.1
= control target key start
LH: loop header
LB: loop body
LE: loop exit
PB: predicated region body
PF: predicated region fallthrough
CT: control target
= control target key end

     0   :  { %s3142_s0 = inlined_call_operand.hbm [shape: f32[2,8,32], index: 0, kind: input, shape index: {}]   ;;  %s3143_s1 = inlined_call_operand.hbm [shape: f32[8,8], index: 1, kind: input, shape index: {}]   ;;  %s3144_s2 = inlined_call_operand.hbm [shape: f32[2,1,32], index: 2, kind: input, shape index: {}]   ;;  %s3145_s3 = inlined_call_operand.hbm [shape: f32[2,1,32], index: 3, kind: input, shape index: {}]   ;;  %s3146_s4 = inlined_call_operand.vmem [shape: bf16[2,32,96], index: 4, kind: input, shape index: {}]   ;;  %s3147_s5 = inlined_call_operand.vmem [shape: f32[2,1,96], index: 5, kind: input, shape index: {}]   ;;  %s3148_s6 = inlined_call_operand.vmem [shape: bf16[2,32,32], index: 6, kind: input, shape index: {}]   ;;  %s3149_s7 = inlined_call_operand.vmem [shape: f32[2,1,32], index: 7, kind: input, shape index: {}]   ;;  %s3150_s8 = inlined_call_operand.vmem [shape: f32[2,1,32], index: 8, kind: input, shape index: {}]   ;;  %s3151_s9 = inlined_call_operand.hbm [shape: f32[2,1,32], index: 9, kind: input, shape index: {}]   ;;  %s3152_s10 = inlined_call_operand.vmem [shape: bf16[2,32,64], index: 10, kind: input, shape index: {}]   ;;  %s3153_s11 = inlined_call_operand.vmem [shape: f32[2,1,64], index: 11, kind: input, shape index: {}]   ;;  %s3154_s12 = inlined_call_operand.vmem [shape: bf16[2,64,32], index: 12, kind: input, shape index: {}]   ;;  %s3155_s13 = inlined_call_operand.vmem [shape: f32[2,1,32], index: 13, kind: input, shape index: {}]   ;;  %s3156_s14 = inlined_call_operand.vmem [shape: f32[1,32], index: 14, kind: input, shape index: {}]   ;;  %s3157_s15 = inlined_call_operand.vmem [shape: f32[1,32], index: 15, kind: input, shape index: {}]   ;;  %s3158_s16 = inlined_call_operand.hbm [shape: f32[2,8,32], index: 16, kind: output, shape index: {}]  }
   0x1   :  { %3159 = sst [smem:[#allocation16_spill]] %s3142_s0 }
   0x2   :  { %21 = vsyncpa [#allocation3], 0 }
   0x3   :  { %22 = vsyncpa [#allocation6], 0 }
   0x4   :  { %23 = vsyncpa [#allocation9], 0  ;;  %s43_s23 = sshll.u32 %s3143_s1, 4  ;;  %s44_s23 = int_to_ptr.hbm [resolvable:$true] %s43_s23 }
   0x5   :  { %24 = vsyncpa [#allocation4], 0  ;;  %s2491_s24 = smov [#allocation5]   ;;  %s66_s28 = sshll.u32 %s3145_s3, 4  ;;  %s67_s28 = int_to_ptr.hbm [resolvable:$true] %s66_s28 }
   0x6   :  { %s45_s25 = sshll.u32 %s2491_s24, 4  ;;  %s2492_s29 = smov [#allocation8]   ;;  %s46_s25 = int_to_ptr.vmem [resolvable:$true] %s45_s25 }
   0x7   :  { %48 = dma.hbm_to_vmem [thread:$0]  %s44_s23, 128, %s46_s25, [#allocation6]  }
   0x8   :  { %s68_s30 = sshll.u32 %s2492_s29, 4  ;;  %s3160_s18 = sld [smem:[#allocation16_spill]]  ;;  %s69_s30 = int_to_ptr.vmem [resolvable:$true] %s68_s30 }
   0x9   :  { %s2493_s1 = smov 16   ;;  %s2494_s20 = smov 1  }
   0xa   :  { %74 = dma.hbm_to_vmem [thread:$0]  %s67_s28, 32, %s69_s30, [#allocation9], %s2493_s1, %s2493_s1, %s2494_s20  }
   0xb   :  { %s2495_s21 = smov [#allocation2]   ;;  %s53_s3 = sshll.u32 %s3144_s2, 4  ;;  %s54_s3 = int_to_ptr.hbm [resolvable:$true] %s53_s3 }
   0xc   :  { %s31_s22 = sshll.u32 %s2495_s21, 4  ;;  %s2496_s25 = smov 128   ;;  %s32_s22 = int_to_ptr.vmem [resolvable:$true] %s31_s22 }
   0xd   :  { %s2497_s26 = smov 8   ;;  %s2498_s27 = smov [#allocation7]  }
   0xe   :  { %s29_s19 = sshll.u32 %s3160_s18, 4  ;;  %s55_s29 = sshll.u32 %s2498_s27, 4  ;;  %s30_s19 = int_to_ptr.hbm [resolvable:$true] %s29_s19  ;;  %s56_s29 = int_to_ptr.vmem [resolvable:$true] %s55_s29 }
   0xf   :  { %37 = dma.hbm_to_vmem [thread:$0]  %s30_s19, 256, %s32_s22, [#allocation3], %s2496_s25, %s2496_s25, %s2497_s26  }
  0x10   :  { %s89_s28 = sshll.u32 %s3151_s9, 4  ;;  %s2499_s30 = smov [#allocation10]   ;;  %s90_s28 = int_to_ptr.hbm [resolvable:$true] %s89_s28 }
  0x11   :  { %61 = dma.hbm_to_vmem [thread:$0]  %s54_s3, 32, %s56_s29, [#allocation6], %s2493_s1, %s2493_s1, %s2494_s20  }
  0x12   :  { %s91_s2 = sshll.u32 %s2499_s30, 4  ;;  %s92_s2 = int_to_ptr.vmem [resolvable:$true] %s91_s2 }
  0x13   :  { %97 = dma.hbm_to_vmem [thread:$0]  %s90_s28, 32, %s92_s2, [#allocation9], %s2493_s1, %s2493_s1, %s2494_s20  }
  0x14   :  { %2483 = dma.done.wait [#allocation3], 256  }
  0x15   :  { %2484 = vsyncadd [#allocation3], 4294967040 }
  0x16   :  { %2485 = dma.done.wait [#allocation6], 160  }
  0x17   :  { %2486 = vsyncadd [#allocation6], 4294967136 }
  0x18   :  { %2487 = dma.done.wait [#allocation9], 64  }
  0x19   :  { %2488 = vsyncadd [#allocation9], 4294967232  ;;  %vm139_vm0 = vcmask 261120   ;;  %v2617_v0 = vld [vmem:[#allocation2] sm:$0xff]  ;;  %v2619_v1 = vld [vmem:[#allocation2 + $0x8] sm:$0xff]  ;;  %v2500_v4 = vmov 32.0  }
  0x1a   :  { %v140_v2 = vsel %vm139_vm0, %v2617_v0, 0.0  ;;  %v143_v3 = vsel %vm139_vm0, %v2619_v1, 0.0  ;;  %2233 = vrcp.f32 %v2500_v4  ;;  %v2149_v21 = vld [vmem:[%s3146_s4 + $0x8] sm:$0xff]  ;;  %v2148_v23 = vld [vmem:[%s3146_s4] sm:$0xff]  ;;  %v2215_v58 = vld [vmem:[#allocation7] ss:$0 sm:$0xff] }
  0x1b   :  { %141 = vadd.xlane.f32.xlu0 %v140_v2  ;;  %263 = vmatpush.bf16.msra.mxu0 %v2149_v21  ;;  %s2501_s23 = smov 104   ;;  %s2502_s24 = smov 120   ;;  %vm304_vm14 = vcmask 64512   ;;  %vm593_vm15 = vcmask 1043456  }
  0x1c   :  { %s2503_s3 = smov 112   ;;  %s2504_s27 = smov 96  }
  0x1d   :  { %s2505_s29 = smov 64   ;;  %s2506_s0 = smov 24  }
  0x1f   :  { %264 = vmatpush.bf16.msra.mxu0 %v2148_v23 }
  0x20   :  { %v2234_v5 = vpop.eup %2233 }
  0x21   :  { %v147_v6 = vmul.f32 32.0, %v2234_v5  ;;  %vm151_vm1 = vweird.f32 %v2234_v5 }
  0x23   :  { %144 = vadd.xlane.f32.xlu0 %v143_v3  ;;  %v148_v7 = vsub.f32 1.0, %v147_v6 }
  0x25   :  { %v149_v8 = vmul.f32 %v2234_v5, %v148_v7 }
  0x27   :  { %v150_v9 = vadd.f32 %v2234_v5, %v149_v8 }
  0x29   :  { %v2625_v10 = vsel %vm151_vm1, %v2234_v5, %v150_v9  ;;  %vm770_vm1 = vcmask 130048  }
  0x8e   :  { %v142_v11 = vpop.xlane.xlu0 %141 }
  0x8f   :  { %v153_v12 = vmul.f32 %v2625_v10, %v142_v11  ;;  %v2216_v11 = vld [vmem:[#allocation8] ss:$0 sm:$0xff] }
  0x91   :  { %v2629_v13 = vsub.f32 %v2617_v0, %v153_v12 }
  0x93   :  { %v157_v14 = vmul.f32 %v2629_v13, %v2629_v13  ;;  %v194_v4 = vmul.f32 %v2215_v58, %v2629_v13  ;;  %v2217_v13 = vld [vmem:[%s3147_s5] ss:$0 sm:$0xff] }
  0x95   :  { %v159_v15 = vsel %vm139_vm0, %v157_v14, 0.0 }
  0x96   :  { %160 = vadd.xlane.f32.xlu1 %v159_v15  ;;  %v145_v16 = vpop.xlane.xlu0 %144 }
  0x97   :  { %v154_v17 = vmul.f32 %v2625_v10, %v145_v16 }
  0x99   :  { %v2636_v18 = vsub.f32 %v2619_v1, %v154_v17 }
  0x9b   :  { %v158_v19 = vmul.f32 %v2636_v18, %v2636_v18  ;;  %v195_v7 = vmul.f32 %v2215_v58, %v2636_v18 }
  0x9d   :  { %v162_v20 = vsel %vm139_vm0, %v158_v19, 0.0 }
  0x9e   :  { %163 = vadd.xlane.f32.xlu1 %v162_v20 }
 0x109   :  { %v161_v22 = vpop.xlane.xlu1 %160 }
 0x10a   :  { %v165_v24 = vmul.f32 0.032258064, %v161_v22 }
 0x10c   :  { %2235 = vrsqrt.f32 %v165_v24  ;;  %vm174_vm2 = vcmp.eq.f32.partialorder %v165_v24, inf  ;;  %v177_v37 = vand.u32 2147483648, %v165_v24  ;;  %vm176_vm3 = vcmp.eq.f32.partialorder %v165_v24, 0.0 }
 0x111   :  { %v164_v25 = vpop.xlane.xlu1 %163 }
 0x112   :  { %v2236_v26 = vpop.eup %2235  ;;  %v166_v27 = vmul.f32 0.032258064, %v164_v25 }
 0x113   :  { %v168_v28 = vmul.f32 %v2236_v26, %v165_v24 }
 0x114   :  { %2237 = vrsqrt.f32 %v166_v27  ;;  %vm186_vm4 = vcmp.eq.f32.partialorder %v166_v27, inf  ;;  %v189_v45 = vand.u32 2147483648, %v166_v27  ;;  %vm188_vm5 = vcmp.eq.f32.partialorder %v166_v27, 0.0 }
 0x115   :  { %v169_v29 = vmul.f32 %v2236_v26, %v168_v28 }
 0x117   :  { %v170_v30 = vmul.f32 0.5, %v169_v29 }
 0x119   :  { %v171_v31 = vsub.f32 1.5, %v170_v30 }
 0x11a   :  { %v2238_v32 = vpop.eup %2237 }
 0x11b   :  { %v172_v33 = vmul.f32 %v2236_v26, %v171_v31  ;;  %v180_v34 = vmul.f32 %v2238_v32, %v166_v27 }
 0x11d   :  { %v173_v35 = vmul.f32 %v172_v33, %v165_v24  ;;  %v181_v36 = vmul.f32 %v2238_v32, %v180_v34 }
 0x11f   :  { %v175_v38 = vsel %vm174_vm2, %v165_v24, %v173_v35  ;;  %v182_v39 = vmul.f32 0.5, %v181_v36  ;;  %vm772_vm2 = vcmask 195584  }
 0x120   :  { %v178_v40 = vsel %vm176_vm3, %v177_v37, %v175_v38 }
 0x121   :  { %v183_v41 = vsub.f32 1.5, %v182_v39  ;;  %v196_v42 = vadd.f32 1e-06, %v178_v40 }
 0x123   :  { %v184_v43 = vmul.f32 %v2238_v32, %v183_v41  ;;  %2239 = vrcp.f32 %v196_v42  ;;  %v209_v55 = vand.u32 2147483648, %v196_v42  ;;  %vm203_vm7 = vweird.f32 %v196_v42 }
 0x124   :  { %v207_v56 = vand.u32 2147483647, %v196_v42 }
 0x125   :  { %v185_v44 = vmul.f32 %v184_v43, %v166_v27  ;;  %v210_v61 = vor.u32 1.1754944e-38, %v209_v55 }
 0x126   :  { %vm208_vm9 = vcmp.eq.f32.partialorder %v207_v56, 8.507059e+37 }
 0x127   :  { %v187_v46 = vsel %vm186_vm4, %v166_v27, %v185_v44 }
 0x128   :  { %v190_v47 = vsel %vm188_vm5, %v189_v45, %v187_v46 }
 0x129   :  { %v2240_v48 = vpop.eup %2239  ;;  %v197_v49 = vadd.f32 1e-06, %v190_v47 }
 0x12a   :  { %v199_v50 = vmul.f32 %v2240_v48, %v196_v42  ;;  %vm204_vm6 = vweird.f32 %v2240_v48 }
 0x12b   :  { %2241 = vrcp.f32 %v197_v49  ;;  %vm205_vm8 = vmor %vm203_vm7, %vm204_vm6  ;;  %v224_v62 = vand.u32 2147483648, %v197_v49  ;;  %v222_v2 = vand.u32 2147483647, %v197_v49  ;;  %vm218_vm11 = vweird.f32 %v197_v49 }
 0x12c   :  { %v200_v51 = vsub.f32 1.0, %v199_v50 }
 0x12d   :  { %v225_v6 = vor.u32 1.1754944e-38, %v224_v62  ;;  %vm223_vm13 = vcmp.eq.f32.partialorder %v222_v2, 8.507059e+37 }
 0x12e   :  { %v201_v52 = vmul.f32 %v2240_v48, %v200_v51 }
 0x130   :  { %v202_v53 = vadd.f32 %v2240_v48, %v201_v52 }
 0x131   :  { %v2242_v54 = vpop.eup %2241 }
 0x132   :  { %v214_v57 = vmul.f32 %v2242_v54, %v197_v49  ;;  %v206_v59 = vsel %vm205_vm8, %v2240_v48, %v202_v53  ;;  %vm219_vm10 = vweird.f32 %v2242_v54 }
 0x133   :  { %v211_v3 = vsel %vm208_vm9, %v210_v61, %v206_v59  ;;  %vm220_vm12 = vmor %vm218_vm11, %vm219_vm10 }
 0x134   :  { %v215_v60 = vsub.f32 1.0, %v214_v57  ;;  %v212_v8 = vmul.f32 %v211_v3, %v194_v4 }
 0x136   :  { %v216_v63 = vmul.f32 %v2242_v54, %v215_v60  ;;  %v231_v15 = vadd.f32 %v2216_v11, %v212_v8  ;;  %v134_v8 = vld [vmem:[#allocation5] sm:$0xff] }
 0x138   :  { %v217_v5 = vadd.f32 %v2242_v54, %v216_v63 }
 0x13a   :  { %v221_v9 = vsel %vm220_vm12, %v2242_v54, %v217_v5 }
 0x13b   :  { %v226_v12 = vsel %vm223_vm13, %v225_v6, %v221_v9  ;;  %v2002_v9 = vadd.f32 -1.0, %v134_v8 }
 0x13c   :  { %v227_v14 = vmul.f32 %v226_v12, %v195_v7 }
 0x13e   :  { %v232_v16 = vadd.f32 %v2216_v11, %v227_v14  ;;  %v2707_v11 = vmul.f32 1e+09, %v2002_v9 }
 0x140   :  { %v233_v17 = vpack.c.bf16 %v232_v16, %v231_v15 }
 0x142   :  { %2011 = vmatmul.msk.bf16.vlgmr.msra.gmra.mxu0 %vm139_vm0, %v233_v17 }
 0x1bf   :  { %v266_v19 = vpop.f32.mrf.mxu0 }
 0x1c0   :  { %v267_v20 = vadd.f32 %v2217_v13, %v266_v19 }
 0x1c2   :  { %278 = vrot.lane.b32.xlu0 %v267_v20, %s2501_s23  ;;  %272 = vrot.lane.b32.xlu2 %v267_v20, %s2502_s24  ;;  %v291_v49 = vpack.c.bf16 %v267_v20, %v267_v20 }
 0x1c4   :  { %v300_v50 = vunpack.c.l.b16 %v291_v49 }
 0x1c6   :  { %v2687_v51 = vpack.c.b16 %v300_v50, %v300_v50 }
 0x1c7   :  { %v268_v18 = vpop.f32.mrf.mxu0 }
 0x1c8   :  { %v269_v21 = vadd.f32 %v2217_v13, %v268_v18 }
 0x1ca   :  { %282 = vrot.lane.b32.xlu1 %v269_v21, %s2502_s24  ;;  %275 = vrot.lane.b32.xlu2 %v267_v20, %s2503_s3  ;;  %v295_v34 = vpack.c.bf16 %v269_v21, %v269_v21 }
 0x1cc   :  { %v397_v37 = vunpack.c.l.b16 %v295_v34 }
 0x1ce   :  { %v2673_v42 = vpack.c.b16 %v397_v37, %v397_v37 }
 0x1d2   :  { %285 = vrot.lane.b32.xlu2 %v269_v21, %s2503_s3 }
 0x1da   :  { %288 = vrot.lane.b32.xlu2 %v269_v21, %s2501_s23 }
 0x21c   :  { %v273_v22 = vpop.permute.xlu2 %272 }
 0x21d   :  { %v292_v23 = vpack.c.bf16 %v273_v22, %v273_v22 }
 0x21f   :  { %v325_v24 = vunpack.c.l.b16 %v292_v23 }
 0x221   :  { %v2659_v25 = vpack.c.b16 %v325_v24, %v325_v24 }
 0x223   :  { %327 = vrot.lane.b32.xlu2 %v2659_v25, %s2504_s27 }
 0x224   :  { %v276_v26 = vpop.permute.xlu2 %275 }
 0x225   :  { %v293_v27 = vpack.c.bf16 %v276_v26, %v276_v26 }
 0x227   :  { %v349_v28 = vunpack.c.l.b16 %v293_v27 }
 0x229   :  { %v2663_v29 = vpack.c.b16 %v349_v28, %v349_v28 }
 0x22b   :  { %351 = vrot.lane.b32.xlu0 %v2663_v29, %s2504_s27 }
 0x22c   :  { %v286_v30 = vpop.permute.xlu2 %285 }
 0x22d   :  { %v297_v31 = vpack.c.bf16 %v286_v30, %v286_v30 }
 0x22f   :  { %v445_v32 = vunpack.c.l.b16 %v297_v31 }
 0x231   :  { %v2667_v33 = vpack.c.b16 %v445_v32, %v445_v32 }
 0x233   :  { %447 = vrot.lane.b32.xlu0 %v2667_v33, %s2504_s27 }
 0x234   :  { %v279_v35 = vpop.permute.xlu0 %278  ;;  %v289_v38 = vpop.permute.xlu2 %288 }
 0x235   :  { %v294_v36 = vpack.c.bf16 %v279_v35, %v279_v35  ;;  %v298_v41 = vpack.c.bf16 %v289_v38, %v289_v38 }
 0x237   :  { %v373_v39 = vunpack.c.l.b16 %v294_v36  ;;  %v469_v44 = vunpack.c.l.b16 %v298_v41 }
 0x239   :  { %v2671_v40 = vpack.c.b16 %v373_v39, %v373_v39  ;;  %v2679_v47 = vpack.c.b16 %v469_v44, %v469_v44 }
 0x23b   :  { %375 = vrot.lane.b32.xlu2 %v2671_v40, %s2504_s27  ;;  %399 = vrot.lane.b32.xlu0 %v2673_v42, %s2504_s27 }
 0x23c   :  { %v283_v43 = vpop.permute.xlu1 %282 }
 0x23d   :  { %v296_v45 = vpack.c.bf16 %v283_v43, %v283_v43 }
 0x23f   :  { %v421_v46 = vunpack.c.l.b16 %v296_v45 }
 0x241   :  { %v2681_v48 = vpack.c.b16 %v421_v46, %v421_v46 }
 0x243   :  { %423 = vrot.lane.b32.xlu1 %v2681_v48, %s2504_s27  ;;  %471 = vrot.lane.b32.xlu2 %v2679_v47, %s2504_s27 }
 0x24b   :  { %302 = vrot.lane.b32.xlu1 %v2687_v51, %s2504_s27 }
 0x27d   :  { %v328_v52 = vpop.permute.xlu2 %327 }
 0x27e   :  { %v333_v53 = vsel %vm304_vm14, %v328_v52, 0 }
 0x27f   :  { %342 = vmatpush.bf16.xpose.msra.mxu2 %v333_v53 }
 0x286   :  { %2013 = vmatmul.msk.bf16.vlgmr.msra.gmra.mxu2 %vm304_vm14, %v292_v23 }
 0x295   :  { %v376_v54 = vpop.permute.xlu2 %375 }
 0x296   :  { %v381_v55 = vsel %vm304_vm14, %v376_v54, 0 }
 0x297   :  { %390 = vmatpush.bf16.xpose.msrb.mxu0 %v381_v55 }
 0x29d   :  { %v352_v56 = vpop.permute.xlu0 %351  ;;  %v472_v57 = vpop.permute.xlu2 %471 }
 0x29e   :  { %v477_v58 = vsel %vm304_vm14, %v472_v57, 0  ;;  %2015 = vmatmul.msk.bf16.vlgmr.msrb.gmra.mxu0 %vm304_vm14, %v294_v36  ;;  %v357_v59 = vsel %vm304_vm14, %v352_v56, 0 }
 0x29f   :  { %366 = vmatpush.bf16.xpose.msra.mxu3 %v357_v59  ;;  %486 = vmatpush.bf16.xpose.msra.mxu0 %v477_v58 }
 0x2a5   :  { %v448_v60 = vpop.permute.xlu0 %447 }
 0x2a6   :  { %2014 = vmatmul.msk.bf16.vlgmr.msra.gmra.mxu3 %vm304_vm14, %v293_v27  ;;  %v453_v61 = vsel %vm304_vm14, %v448_v60, 0 }
 0x2a7   :  { %462 = vmatpush.bf16.xpose.msrb.mxu3 %v453_v61 }
 0x2ad   :  { %v400_v2 = vpop.permute.xlu0 %399 }
 0x2ae   :  { %2019 = vmatmul.msk.bf16.vlgmr.msra.gmra.mxu0 %vm304_vm14, %v298_v41  ;;  %v405_v5 = vsel %vm304_vm14, %v400_v2, 0 }
 0x2b5   :  { %v424_v62 = vpop.permute.xlu1 %423 }
 0x2b6   :  { %2018 = vmatmul.msk.bf16.vlgmr.msrb.gmra.mxu3 %vm304_vm14, %v297_v31  ;;  %v429_v63 = vsel %vm304_vm14, %v424_v62, 0 }
 0x2b7   :  { %438 = vmatpush.bf16.xpose.msrb.mxu2 %v429_v63 }
 0x2bd   :  { %v303_v3 = vpop.permute.xlu1 %302 }
 0x2be   :  { %2017 = vmatmul.msk.bf16.vlgmr.msrb.gmra.mxu2 %vm304_vm14, %v296_v45  ;;  %v309_v4 = vsel %vm304_vm14, %v303_v3, 0 }
 0x2bf   :  { %318 = vmatpush.bf16.xpose.msra.mxu1 %v309_v4 }
 0x2c6   :  { %2012 = vmatmul.msk.bf16.vlgmr.msra.gmra.mxu1 %vm304_vm14, %v291_v49 }
 0x2c7   :  { %414 = vmatpush.bf16.xpose.msrb.mxu1 %v405_v5 }
 0x2d6   :  { %2016 = vmatmul.msk.bf16.vlgmr.msrb.gmra.mxu1 %vm304_vm14, %v295_v34 }
 0x309   :  { %v344_v6 = vpop.f32.mrf.mxu2 }
 0x30a   :  { %v345_v36 = vadd.f32 %v344_v6, %v2707_v11 }
 0x30c   :  { %v495_v38 = vsel %vm304_vm14, %v345_v36, -inf }
 0x311   :  { %v346_v7 = vpop.f32.mrf.mxu2 }
 0x31b   :  { %v392_v12 = vpop.f32.mrf.mxu0 }
 0x31c   :  { %v393_v14 = vadd.f32 %v392_v12, %v2707_v11 }
 0x31e   :  { %v501_v15 = vsel %vm304_vm14, %v393_v14, -inf }
 0x31f   :  { %502 = vmax.xlane.f32.xlu0 %v501_v15 }
 0x323   :  { %v394_v16 = vpop.f32.mrf.mxu0 }
 0x329   :  { %v368_v17 = vpop.f32.mrf.mxu3 }
 0x32a   :  { %v369_v13 = vadd.f32 %v368_v17, %v2707_v11 }
 0x32b   :  { %v488_v19 = vpop.f32.mrf.mxu0 }
 0x32c   :  { %v2713_v20 = vadd.f32 %v488_v19, %v2707_v11  ;;  %v498_v18 = vsel %vm304_vm14, %v369_v13, -inf }
 0x32d   :  { %499 = vmax.xlane.f32.xlu1 %v498_v18 }
 0x32e   :  { %v513_v21 = vsel %vm304_vm14, %v2713_v20, -inf }
 0x32f   :  { %514 = vmax.xlane.f32.xlu0 %v513_v21 }
 0x331   :  { %v370_v22 = vpop.f32.mrf.mxu3 }
 0x333   :  { %v490_v23 = vpop.f32.mrf.mxu0 }
 0x339   :  { %v464_v24 = vpop.f32.mrf.mxu3 }
 0x33a   :  { %v2719_v26 = vadd.f32 %v464_v24, %v2707_v11 }
 0x33c   :  { %v510_v27 = vsel %vm304_vm14, %v2719_v26, -inf }
 0x33d   :  { %511 = vmax.xlane.f32.xlu1 %v510_v27 }
 0x341   :  { %v440_v28 = vpop.f32.mrf.mxu2  ;;  %v466_v30 = vpop.f32.mrf.mxu3 }
 0x342   :  { %v441_v39 = vadd.f32 %v440_v28, %v2707_v11 }
 0x343   :  { %v320_v31 = vpop.f32.mrf.mxu1 }
 0x344   :  { %v2724_v32 = vadd.f32 %v320_v31, %v2707_v11  ;;  %v507_v45 = vsel %vm304_vm14, %v441_v39, -inf }
 0x346   :  { %v492_v34 = vsel %vm304_vm14, %v2724_v32, -inf }
 0x347   :  { %493 = vmax.xlane.f32.xlu2 %v492_v34 }
 0x349   :  { %v442_v35 = vpop.f32.mrf.mxu2 }
 0x34b   :  { %v322_v37 = vpop.f32.mrf.mxu1 }
 0x34f   :  { %496 = vmax.xlane.f32.xlu2 %v495_v38 }
 0x353   :  { %v416_v41 = vpop.f32.mrf.mxu1 }
 0x354   :  { %v417_v43 = vadd.f32 %v416_v41, %v2707_v11 }
 0x356   :  { %v504_v44 = vsel %vm304_vm14, %v417_v43, -inf }
 0x357   :  { %505 = vmax.xlane.f32.xlu0 %v504_v44  ;;  %508 = vmax.xlane.f32.xlu2 %v507_v45 }
 0x35b   :  { %v418_v46 = vpop.f32.mrf.mxu1 }
 0x36b   :  { %652 = vrot.lane.b32.xlu0 %v2671_v40, %s2505_s29 }
 0x373   :  { %694 = vrot.lane.b32.xlu0 %v2681_v48, %s2505_s29 }
 0x37b   :  { %715 = vrot.lane.b32.xlu0 %v2667_v33, %s2505_s29 }
 0x392   :  { %v503_v49 = vpop.xlane.xlu0 %502 }
 0x393   :  { %v519_v50 = vsub.f32 %v393_v14, %v503_v49 }
 0x395   :  { %v530_v52 = vmul.f32 1.442695, %v519_v50 }
 0x397   :  { %2243 = vpow2.f32 %v530_v52 }
 0x39d   :  { %v2740_v53 = vpop.eup %2243 }
 0x39e   :  { %v549_v54 = vsel %vm304_vm14, %v2740_v53, 0.0 }
 0x39f   :  { %550 = vadd.xlane.f32.xlu2 %v549_v54 }
 0x3a0   :  { %v500_v55 = vpop.xlane.xlu1 %499 }
 0x3a1   :  { %v518_v56 = vsub.f32 %v369_v13, %v500_v55 }
 0x3a2   :  { %v515_v62 = vpop.xlane.xlu0 %514 }
 0x3a3   :  { %v528_v57 = vmul.f32 1.442695, %v518_v56  ;;  %v523_v4 = vsub.f32 %v2713_v20, %v515_v62 }
 0x3a5   :  { %2245 = vpow2.f32 %v528_v57  ;;  %v538_v6 = vmul.f32 1.442695, %v523_v4 }
 0x3ab   :  { %v2744_v40 = vpop.eup %2245 }
 0x3ac   :  { %v546_v48 = vsel %vm304_vm14, %v2744_v40, 0.0 }
 0x3ad   :  { %547 = vadd.xlane.f32.xlu0 %v546_v48 }
 0x3b0   :  { %v512_v20 = vpop.xlane.xlu1 %511 }
 0x3b1   :  { %v522_v18 = vsub.f32 %v2719_v26, %v512_v20 }
 0x3b3   :  { %v536_v21 = vmul.f32 1.442695, %v522_v18 }
 0x3b7   :  { %631 = vrot.lane.b32.xlu2 %v2663_v29, %s2505_s29 }
 0x3ba   :  { %v494_v33 = vpop.xlane.xlu2 %493 }
 0x3bb   :  { %v516_v22 = vsub.f32 %v2724_v32, %v494_v33 }
 0x3bd   :  { %v524_v23 = vmul.f32 1.442695, %v516_v22 }
 0x3c2   :  { %v497_v58 = vpop.xlane.xlu2 %496 }
 0x3c3   :  { %v517_v59 = vsub.f32 %v345_v36, %v497_v58 }
 0x3c5   :  { %v526_v60 = vmul.f32 1.442695, %v517_v59 }
 0x3c7   :  { %2247 = vpow2.f32 %v526_v60 }
 0x3ca   :  { %v509_v61 = vpop.xlane.xlu2 %508  ;;  %v506_v29 = vpop.xlane.xlu0 %505 }
 0x3cb   :  { %v521_v63 = vsub.f32 %v441_v39, %v509_v61  ;;  %v520_v8 = vsub.f32 %v417_v43, %v506_v29 }
 0x3cd   :  { %v2750_v2 = vpop.eup %2247  ;;  %v534_v3 = vmul.f32 1.442695, %v521_v63  ;;  %v532_v12 = vmul.f32 1.442695, %v520_v8 }
 0x3ce   :  { %v543_v5 = vsel %vm304_vm14, %v2750_v2, 0.0 }
 0x3cf   :  { %544 = vadd.xlane.f32.xlu1 %v543_v5  ;;  %2249 = vpow2.f32 %v534_v3 }
 0x3d0   :  { %2251 = vpow2.f32 %v538_v6 }
 0x3d1   :  { %2253 = vpow2.f32 %v532_v12 }
 0x3d2   :  { %2255 = vpow2.f32 %v536_v21 }
 0x3d3   :  { %2257 = vpow2.f32 %v524_v23 }
 0x3d5   :  { %v2755_v7 = vpop.eup %2249 }
 0x3d6   :  { %v555_v9 = vsel %vm304_vm14, %v2755_v7, 0.0  ;;  %v2252_v14 = vpop.eup %2251 }
 0x3d7   :  { %556 = vadd.xlane.f32.xlu0 %v555_v9  ;;  %v561_v17 = vsel %vm304_vm14, %v2252_v14, 0.0  ;;  %v2761_v13 = vpop.eup %2253 }
 0x3d8   :  { %v552_v19 = vsel %vm304_vm14, %v2761_v13, 0.0  ;;  %v2256_v24 = vpop.eup %2255 }
 0x3d9   :  { %v558_v28 = vsel %vm304_vm14, %v2256_v24, 0.0 }
 0x3dd   :  { %v653_v15 = vpop.permute.xlu0 %652 }
 0x3de   :  { %v658_v16 = vsel %vm593_vm15, %v653_v15, 0 }
 0x3df   :  { %667 = vmatpush.bf16.msrb.mxu0 %v658_v16 }
 0x3e0   :  { %562 = vadd.xlane.f32.xlu2 %v561_v17 }
 0x3e5   :  { %v695_v27 = vpop.permute.xlu0 %694 }
 0x3e6   :  { %v700_v54 = vsel %vm593_vm15, %v695_v27, 0 }
 0x3e8   :  { %553 = vadd.xlane.f32.xlu2 %v552_v19  ;;  %610 = vrot.lane.b32.xlu1 %v2659_v25, %s2505_s29  ;;  %v2258_v25 = vpop.eup %2257 }
 0x3eb   :  { %736 = vrot.lane.b32.xlu0 %v2679_v47, %s2505_s29  ;;  %v540_v47 = vsel %vm304_vm14, %v2258_v25, 0.0 }
 0x3ed   :  { %v716_v26 = vpop.permute.xlu0 %715 }
 0x3ee   :  { %v721_v35 = vsel %vm593_vm15, %v716_v26, 0 }
 0x400   :  { %673 = vrot.lane.b32.xlu2 %v2673_v42, %s2505_s29 }
 0x412   :  { %v551_v30 = vpop.xlane.xlu2 %550  ;;  %559 = vadd.xlane.f32.xlu1 %v558_v28 }
 0x413   :  { %2259 = vrcp.f32 %v551_v30 }
 0x415   :  { %541 = vadd.xlane.f32.xlu0 %v540_v47 }
 0x419   :  { %v2260_v31 = vpop.eup %2259 }
 0x41a   :  { %v575_v42 = vmul.f32 %v2260_v31, %v2740_v53  ;;  %v632_v34 = vpop.permute.xlu2 %631 }
 0x41b   :  { %v637_v32 = vsel %vm593_vm15, %v632_v34, 0  ;;  %v2151_v34 = vld [vmem:[%s3148_s6 + $0x8] sm:$0xff] }
 0x41c   :  { %v583_v36 = vpack.c.bf16 %v575_v42, %v575_v42  ;;  %646 = vmatpush.bf16.msra.mxu3 %v637_v32  ;;  %v2150_v32 = vld [vmem:[%s3148_s6] sm:$0xff] }
 0x41e   :  { %2023 = vmatmul.msk.bf16.vlgmr.msrb.gmra.mxu0 %vm304_vm14, %v583_v36 }
 0x420   :  { %730 = vmatpush.bf16.msrb.mxu3 %v721_v35  ;;  %v548_v37 = vpop.xlane.xlu0 %547 }
 0x421   :  { %2261 = vrcp.f32 %v548_v37 }
 0x427   :  { %v2262_v38 = vpop.eup %2261 }
 0x428   :  { %v574_v39 = vmul.f32 %v2262_v38, %v2744_v40 }
 0x42a   :  { %v582_v41 = vpack.c.bf16 %v574_v39, %v574_v39 }
 0x42b   :  { %588 = vrot.lane.b32.xlu1 %v2687_v51, %s2505_s29 }
 0x42c   :  { %2022 = vmatmul.msk.bf16.vlgmr.msra.gmra.mxu3 %vm304_vm14, %v582_v41 }
 0x442   :  { %v545_v43 = vpop.xlane.xlu1 %544 }
 0x443   :  { %2263 = vrcp.f32 %v545_v43 }
 0x449   :  { %v2264_v45 = vpop.eup %2263 }
 0x44a   :  { %v557_v46 = vpop.xlane.xlu0 %556  ;;  %v573_v49 = vmul.f32 %v2264_v45, %v2750_v2 }
 0x44c   :  { %v581_v55 = vpack.c.bf16 %v573_v49, %v573_v49 }
 0x453   :  { %v563_v44 = vpop.xlane.xlu2 %562 }
 0x454   :  { %2265 = vrcp.f32 %v563_v44 }
 0x455   :  { %2267 = vrcp.f32 %v557_v46 }
 0x45a   :  { %v2266_v50 = vpop.eup %2265  ;;  %v611_v52 = vpop.permute.xlu1 %610 }
 0x45b   :  { %v616_v53 = vsel %vm593_vm15, %v611_v52, 0  ;;  %v579_v56 = vmul.f32 %v2266_v50, %v2252_v14  ;;  %v2268_v48 = vpop.eup %2267  ;;  %v554_v2 = vpop.xlane.xlu2 %553 }
 0x45c   :  { %625 = vmatpush.bf16.msra.mxu2 %v616_v53  ;;  %v577_v33 = vmul.f32 %v2268_v48, %v2755_v7 }
 0x45d   :  { %v737_v51 = vpop.permute.xlu0 %736  ;;  %v587_v40 = vpack.c.bf16 %v579_v56, %v579_v56  ;;  %v2218_v56 = vld [vmem:[%s3149_s7] ss:$0 sm:$0xff] }
 0x45e   :  { %v742_v57 = vsel %vm593_vm15, %v737_v51, 0  ;;  %v585_v58 = vpack.c.bf16 %v577_v33, %v577_v33 }
 0x45f   :  { %2021 = vmatmul.msk.bf16.vlgmr.msra.gmra.mxu2 %vm304_vm14, %v581_v55  ;;  %751 = vmatpush.bf16.msra.mxu0 %v742_v57 }
 0x460   :  { %709 = vmatpush.bf16.msrb.mxu2 %v700_v54 }
 0x462   :  { %2027 = vmatmul.msk.bf16.vlgmr.msra.gmra.mxu0 %vm304_vm14, %v587_v40 }
 0x463   :  { %v674_v5 = vpop.permute.xlu2 %673 }
 0x464   :  { %v679_v8 = vsel %vm593_vm15, %v674_v5, 0 }
 0x46f   :  { %2025 = vmatmul.msk.bf16.vlgmr.msrb.gmra.mxu2 %vm304_vm14, %v585_v58 }
 0x485   :  { %v560_v59 = vpop.xlane.xlu1 %559 }
 0x486   :  { %2269 = vrcp.f32 %v560_v59 }
 0x488   :  { %v542_v63 = vpop.xlane.xlu0 %541 }
 0x489   :  { %2271 = vrcp.f32 %v542_v63 }
 0x48a   :  { %2273 = vrcp.f32 %v554_v2 }
 0x48c   :  { %v2270_v60 = vpop.eup %2269 }
 0x48d   :  { %v578_v61 = vmul.f32 %v2270_v60, %v2256_v24 }
 0x48f   :  { %v586_v62 = vpack.c.bf16 %v578_v61, %v578_v61  ;;  %v2272_v3 = vpop.eup %2271 }
 0x490   :  { %v572_v6 = vmul.f32 %v2272_v3, %v2258_v25  ;;  %v2274_v14 = vpop.eup %2273 }
 0x491   :  { %2026 = vmatmul.msk.bf16.vlgmr.msrb.gmra.mxu3 %vm304_vm14, %v586_v62  ;;  %v576_v15 = vmul.f32 %v2274_v14, %v2761_v13 }
 0x492   :  { %v580_v9 = vpack.c.bf16 %v572_v6, %v572_v6 }
 0x493   :  { %v584_v17 = vpack.c.bf16 %v576_v15, %v576_v15 }
 0x49b   :  { %v669_v4 = vpop.f32.mrf.mxu0 }
 0x49d   :  { %v589_v29 = vpop.permute.xlu1 %588 }
 0x49e   :  { %v595_v7 = vsel %vm593_vm15, %v589_v29, 0 }
 0x49f   :  { %604 = vmatpush.bf16.msra.mxu1 %v595_v7 }
 0x4a2   :  { %2020 = vmatmul.msk.bf16.vlgmr.msra.gmra.mxu1 %vm304_vm14, %v580_v9  ;;  %v2152_v9 = vld [vmem:[%s3152_s10] sm:$0xff] }
 0x4a3   :  { %688 = vmatpush.bf16.msrb.mxu1 %v679_v8  ;;  %v671_v12 = vpop.f32.mrf.mxu0  ;;  %v2153_v8 = vld [vmem:[%s3152_s10 + $0x8] sm:$0xff] }
 0x4a4   :  { %947 = vmatpush.bf16.msra.mxu2 %v2153_v8  ;;  %v2221_v8 = vld [vmem:[%s3153_s11] ss:$0 sm:$0xff] }
 0x4a7   :  { %819 = vmatpush.bf16.msra.mxu1 %v2151_v34 }
 0x4a8   :  { %948 = vmatpush.bf16.msra.mxu2 %v2152_v9 }
 0x4ab   :  { %820 = vmatpush.bf16.msra.mxu1 %v2150_v32 }
 0x4af   :  { %v648_v16 = vpop.f32.mrf.mxu3 }
 0x4b2   :  { %2024 = vmatmul.msk.bf16.vlgmr.msrb.gmra.mxu1 %vm304_vm14, %v584_v17 }
 0x4b7   :  { %v650_v19 = vpop.f32.mrf.mxu3 }
 0x4df   :  { %v753_v20 = vpop.f32.mrf.mxu0 }
 0x4e0   :  { %v2195_v18 = vpack.i.bf16 %v753_v20, %v669_v4 }
 0x4e2   :  { %v627_v21 = vpop.f32.mrf.mxu2  ;;  %2196 = vrot.lane.b32.xlu2 %v2195_v18, %s2506_s0 }
 0x4e7   :  { %v755_v22 = vpop.f32.mrf.mxu0 }
 0x4ea   :  { %v629_v23 = vpop.f32.mrf.mxu2 }
 0x4f2   :  { %v711_v24 = vpop.f32.mrf.mxu2 }
 0x4f3   :  { %v2185_v27 = vpack.i.bf16 %v711_v24, %v627_v21 }
 0x4f5   :  { %2186 = vrot.lane.b32.xlu1 %v2185_v27, %s2497_s26 }
 0x4fa   :  { %v713_v28 = vpop.f32.mrf.mxu2 }
 0x514   :  { %v732_v25 = vpop.f32.mrf.mxu3 }
 0x515   :  { %v2190_v13 = vpack.i.bf16 %v732_v25, %v648_v16 }
 0x517   :  { %2191 = vrot.lane.b32.xlu1 %v2190_v13, %s2493_s1 }
 0x51c   :  { %v734_v30 = vpop.f32.mrf.mxu3 }
 0x51f   :  { %v606_v47 = vpop.f32.mrf.mxu1 }
 0x527   :  { %v608_v26 = vpop.f32.mrf.mxu1 }
 0x52f   :  { %v690_v31 = vpop.f32.mrf.mxu1 }
 0x537   :  { %v692_v42 = vpop.f32.mrf.mxu1 }
 0x53c   :  { %v2197_v38 = vpop.permute.xlu2 %2196 }
 0x53d   :  { %v2199_v44 = vunpack.i.h.bf16 %v2197_v38  ;;  %v2198_v45 = vunpack.i.l.bf16 %v2197_v38 }
 0x567   :  { %v2187_v35 = vpop.permute.xlu1 %2186 }
 0x568   :  { %v2189_v36 = vunpack.i.h.bf16 %v2187_v35  ;;  %v2188_v37 = vunpack.i.l.bf16 %v2187_v35 }
 0x56a   :  { %v786_v46 = vsel %vm304_vm14, %v690_v31, %v2189_v36  ;;  %v769_v49 = vsel %vm304_vm14, %v606_v47, %v2188_v37 }
 0x589   :  { %v2192_v39 = vpop.permute.xlu1 %2191 }
 0x58a   :  { %v2194_v41 = vunpack.i.h.bf16 %v2192_v39  ;;  %v2193_v43 = vunpack.i.l.bf16 %v2192_v39 }
 0x58c   :  { %v771_v50 = vsel %vm770_vm1, %v769_v49, %v2193_v43  ;;  %v787_v52 = vsel %vm770_vm1, %v786_v46, %v2194_v41  ;;  %v2219_v49 = vld [vmem:[%s3150_s8] ss:$0 sm:$0xff] }
 0x58d   :  { %v773_v53 = vsel %vm772_vm2, %v771_v50, %v2198_v45  ;;  %v788_v54 = vsel %vm772_vm2, %v787_v52, %v2199_v44 }
 0x58e   :  { %v789_v55 = vpack.c.bf16 %v788_v54, %v773_v53 }
 0x590   :  { %2036 = vmatmul.msk.bf16.vlgmr.msra.gmra.mxu1 %vm139_vm0, %v789_v55 }
 0x60d   :  { %v822_v51 = vpop.f32.mrf.mxu1 }
 0x60e   :  { %v823_v57 = vadd.f32 %v2218_v56, %v822_v51 }
 0x610   :  { %v2817_v40 = vadd.f32 %v823_v57, %v2617_v0 }
 0x612   :  { %v831_v48 = vsel %vm139_vm0, %v2817_v40, 0.0 }
 0x613   :  { %832 = vadd.xlane.f32.xlu0 %v831_v48 }
 0x615   :  { %v824_v33 = vpop.f32.mrf.mxu1 }
 0x616   :  { %v825_v58 = vadd.f32 %v2218_v56, %v824_v33 }
 0x618   :  { %v2822_v59 = vadd.f32 %v825_v58, %v2619_v1 }
 0x61a   :  { %v834_v60 = vsel %vm139_vm0, %v2822_v59, 0.0 }
 0x61b   :  { %835 = vadd.xlane.f32.xlu1 %v834_v60 }
 0x686   :  { %v833_v61 = vpop.xlane.xlu0 %832 }
 0x687   :  { %v837_v62 = vmul.f32 %v833_v61, %v2625_v10 }
 0x689   :  { %v2828_v63 = vsub.f32 %v2817_v40, %v837_v62  ;;  %v2220_v62 = vld [vmem:[#allocation10] ss:$0 sm:$0xff] }
 0x68b   :  { %v841_v0 = vmul.f32 %v2828_v63, %v2828_v63  ;;  %v878_v57 = vmul.f32 %v2219_v49, %v2828_v63  ;;  %v2157_v63 = vld [vmem:[%s3154_s12 + $0x18] sm:$0xff] }
 0x68c   :  { %1002 = vmatpush.bf16.msra.mxu3 %v2157_v63 }
 0x68d   :  { %v843_v2 = vsel %vm139_vm0, %v841_v0, 0.0 }
 0x68e   :  { %v836_v3 = vpop.xlane.xlu1 %835  ;;  %844 = vadd.xlane.f32.xlu2 %v843_v2 }
 0x68f   :  { %v838_v1 = vmul.f32 %v836_v3, %v2625_v10 }
 0x691   :  { %v2835_v4 = vsub.f32 %v2822_v59, %v838_v1 }
 0x693   :  { %v842_v5 = vmul.f32 %v2835_v4, %v2835_v4  ;;  %v879_v58 = vmul.f32 %v2219_v49, %v2835_v4  ;;  %v2156_v4 = vld [vmem:[%s3154_s12 + $0x10] sm:$0xff] }
 0x694   :  { %1003 = vmatpush.bf16.msra.mxu3 %v2156_v4 }
 0x695   :  { %v846_v6 = vsel %vm139_vm0, %v842_v5, 0.0 }
 0x696   :  { %847 = vadd.xlane.f32.xlu0 %v846_v6  ;;  %v2155_v6 = vld [vmem:[%s3154_s12 + $0x8] sm:$0xff] }
 0x698   :  { %1004 = vmatpush.bf16.msra.mxu3 %v2155_v6 }
 0x701   :  { %v845_v29 = vpop.xlane.xlu2 %844 }
 0x702   :  { %v849_v7 = vmul.f32 0.032258064, %v845_v29  ;;  %v2154_v29 = vld [vmem:[%s3154_s12] sm:$0xff] }
 0x703   :  { %1005 = vmatpush.bf16.msra.mxu3 %v2154_v29 }
 0x704   :  { %2275 = vrsqrt.f32 %v849_v7  ;;  %vm858_vm3 = vcmp.eq.f32.partialorder %v849_v7, inf  ;;  %v861_v27 = vand.u32 2147483648, %v849_v7  ;;  %vm860_vm4 = vcmp.eq.f32.partialorder %v849_v7, 0.0 }
 0x709   :  { %v848_v12 = vpop.xlane.xlu0 %847 }
 0x70a   :  { %v2276_v14 = vpop.eup %2275  ;;  %v850_v15 = vmul.f32 0.032258064, %v848_v12 }
 0x70b   :  { %v852_v16 = vmul.f32 %v2276_v14, %v849_v7 }
 0x70c   :  { %2277 = vrsqrt.f32 %v850_v15  ;;  %vm870_vm5 = vcmp.eq.f32.partialorder %v850_v15, inf  ;;  %v873_v42 = vand.u32 2147483648, %v850_v15  ;;  %vm872_vm6 = vcmp.eq.f32.partialorder %v850_v15, 0.0 }
 0x70d   :  { %v853_v17 = vmul.f32 %v2276_v14, %v852_v16 }
 0x70f   :  { %v854_v19 = vmul.f32 0.5, %v853_v17 }
 0x711   :  { %v855_v20 = vsub.f32 1.5, %v854_v19  ;;  %v2222_v19 = vld [vmem:[%s3155_s13] ss:$0 sm:$0xff] }
 0x712   :  { %v2278_v18 = vpop.eup %2277 }
 0x713   :  { %v856_v21 = vmul.f32 %v2276_v14, %v855_v20  ;;  %v864_v22 = vmul.f32 %v2278_v18, %v850_v15 }
 0x715   :  { %v857_v23 = vmul.f32 %v856_v21, %v849_v7  ;;  %v865_v24 = vmul.f32 %v2278_v18, %v864_v22 }
 0x717   :  { %v859_v28 = vsel %vm858_vm3, %v849_v7, %v857_v23  ;;  %v866_v25 = vmul.f32 0.5, %v865_v24 }
 0x718   :  { %v862_v13 = vsel %vm860_vm4, %v861_v27, %v859_v28  ;;  %vm994_vm4 = vcmask 523264  }
 0x719   :  { %v880_v30 = vadd.f32 1e-06, %v862_v13  ;;  %v867_v47 = vsub.f32 1.5, %v866_v25 }
 0x71b   :  { %2279 = vrcp.f32 %v880_v30  ;;  %v868_v26 = vmul.f32 %v2278_v18, %v867_v47  ;;  %v893_v44 = vand.u32 2147483648, %v880_v30  ;;  %vm887_vm8 = vweird.f32 %v880_v30 }
 0x71c   :  { %v891_v45 = vand.u32 2147483647, %v880_v30 }
 0x71d   :  { %v869_v31 = vmul.f32 %v868_v26, %v850_v15  ;;  %v894_v53 = vor.u32 1.1754944e-38, %v893_v44 }
 0x71e   :  { %vm892_vm10 = vcmp.eq.f32.partialorder %v891_v45, 8.507059e+37 }
 0x71f   :  { %v871_v34 = vsel %vm870_vm5, %v850_v15, %v869_v31 }
 0x720   :  { %v874_v32 = vsel %vm872_vm6, %v873_v42, %v871_v34 }
 0x721   :  { %v2280_v35 = vpop.eup %2279  ;;  %v881_v36 = vadd.f32 1e-06, %v874_v32 }
 0x722   :  { %v883_v37 = vmul.f32 %v2280_v35, %v880_v30  ;;  %vm888_vm7 = vweird.f32 %v2280_v35 }
 0x723   :  { %2281 = vrcp.f32 %v881_v36  ;;  %vm889_vm9 = vmor %vm887_vm8, %vm888_vm7  ;;  %v908_v54 = vand.u32 2147483648, %v881_v36  ;;  %v906_v56 = vand.u32 2147483647, %v881_v36  ;;  %vm902_vm12 = vweird.f32 %v881_v36 }
 0x724   :  { %v884_v38 = vsub.f32 1.0, %v883_v37  ;;  %v2158_v37 = vld [vmem:[%s3146_s4 + $0x10] sm:$0xff] }
 0x725   :  { %v909_v33 = vor.u32 1.1754944e-38, %v908_v54  ;;  %vm907_vm3 = vcmp.eq.f32.partialorder %v906_v56, 8.507059e+37 }
 0x726   :  { %v885_v39 = vmul.f32 %v2280_v35, %v884_v38 }
 0x728   :  { %v886_v41 = vadd.f32 %v2280_v35, %v885_v39 }
 0x729   :  { %v2282_v43 = vpop.eup %2281 }
 0x72a   :  { %v898_v46 = vmul.f32 %v2282_v43, %v881_v36  ;;  %v890_v50 = vsel %vm889_vm9, %v2280_v35, %v886_v41  ;;  %vm903_vm11 = vweird.f32 %v2282_v43  ;;  %v2159_v36 = vld [vmem:[%s3146_s4 + $0x18] sm:$0xff] }
 0x72b   :  { %v895_v51 = vsel %vm892_vm10, %v894_v53, %v890_v50  ;;  %vm904_vm13 = vmor %vm902_vm12, %vm903_vm11  ;;  %1136 = vmatpush.bf16.msrb.mxu0 %v2159_v36 }
 0x72c   :  { %v899_v52 = vsub.f32 1.0, %v898_v46  ;;  %v896_v60 = vmul.f32 %v895_v51, %v878_v57 }
 0x72e   :  { %v900_v55 = vmul.f32 %v2282_v43, %v899_v52  ;;  %v915_v3 = vadd.f32 %v2220_v62, %v896_v60 }
 0x72f   :  { %1137 = vmatpush.bf16.msrb.mxu0 %v2158_v37 }
 0x730   :  { %v901_v48 = vadd.f32 %v2282_v43, %v900_v55 }
 0x732   :  { %v905_v61 = vsel %vm904_vm13, %v2282_v43, %v901_v48 }
 0x733   :  { %v910_v0 = vsel %vm907_vm3, %v909_v33, %v905_v61 }
 0x734   :  { %v911_v2 = vmul.f32 %v910_v0, %v879_v58 }
 0x736   :  { %v916_v1 = vadd.f32 %v2220_v62, %v911_v2 }
 0x738   :  { %v917_v5 = vpack.c.bf16 %v916_v1, %v915_v3 }
 0x73a   :  { %2045 = vmatmul.msk.bf16.vlgmr.msra.gmra.mxu2 %vm139_vm0, %v917_v5 }
 0x7bd   :  { %v950_v7 = vpop.f32.mrf.mxu2 }
 0x7be   :  { %v951_v9 = vadd.f32 %v2221_v8, %v950_v7 }
 0x7c0   :  { %v955_v15 = vmax.f32 %v951_v9, 0.0  ;;  %v2223_v9 = vld [vmem:[#allocation7 + $0x1] ss:$0 sm:$0xff] }
 0x7c5   :  { %v952_v12 = vpop.f32.mrf.mxu2 }
 0x7c6   :  { %v953_v14 = vadd.f32 %v2221_v8, %v952_v12 }
 0x7c8   :  { %v956_v16 = vmax.f32 %v953_v14, 0.0 }
 0x7ca   :  { %v957_v17 = vpack.c.bf16 %v956_v16, %v955_v15 }
 0x7cc   :  { %2062 = vmatmul.msk.bf16.vlgmr.msra.gmra.mxu3 %vm994_vm4, %v957_v17 }
 0x84f   :  { %v1007_v20 = vpop.f32.mrf.mxu3 }
 0x850   :  { %v1008_v18 = vadd.f32 %v2222_v19, %v1007_v20 }
 0x852   :  { %v2872_v21 = vadd.f32 %v1008_v18, %v2817_v40 }
 0x854   :  { %v1018_v22 = vsel %vm139_vm0, %v2872_v21, 0.0 }
 0x855   :  { %1019 = vadd.xlane.f32.xlu0 %v1018_v22 }
 0x857   :  { %v1009_v23 = vpop.f32.mrf.mxu3 }
 0x858   :  { %v1010_v24 = vadd.f32 %v2222_v19, %v1009_v23 }
 0x85a   :  { %v2877_v27 = vadd.f32 %v1010_v24, %v2822_v59 }
 0x85c   :  { %v1021_v28 = vsel %vm139_vm0, %v2877_v27, 0.0 }
 0x85d   :  { %1022 = vadd.xlane.f32.xlu0 %v1021_v28 }
 0x8c8   :  { %v1020_v25 = vpop.xlane.xlu0 %1019 }
 0x8c9   :  { %v1024_v13 = vmul.f32 %v1020_v25, %v2625_v10 }
 0x8cb   :  { %v2883_v30 = vsub.f32 %v2872_v21, %v1024_v13  ;;  %v2224_v13 = vld [vmem:[#allocation8 + $0x1] ss:$0 sm:$0xff] }
 0x8cd   :  { %v1028_v40 = vmul.f32 %v2883_v30, %v2883_v30  ;;  %v1065_v18 = vmul.f32 %v2223_v9, %v2883_v30  ;;  %v2225_v30 = vld [vmem:[%s3147_s5 + $0x1] ss:$0 sm:$0xff] }
 0x8cf   :  { %v1030_v47 = vsel %vm139_vm0, %v1028_v40, 0.0 }
 0x8d0   :  { %1031 = vadd.xlane.f32.xlu0 %v1030_v47  ;;  %v1023_v26 = vpop.xlane.xlu0 %1022 }
 0x8d1   :  { %v1025_v59 = vmul.f32 %v1023_v26, %v2625_v10 }
 0x8d3   :  { %v2890_v31 = vsub.f32 %v2877_v27, %v1025_v59 }
 0x8d5   :  { %v1029_v42 = vmul.f32 %v2890_v31, %v2890_v31  ;;  %v1066_v24 = vmul.f32 %v2223_v9, %v2890_v31 }
 0x8d7   :  { %v1033_v34 = vsel %vm139_vm0, %v1029_v42, 0.0 }
 0x8d8   :  { %1034 = vadd.xlane.f32.xlu0 %v1033_v34 }
 0x943   :  { %v1032_v32 = vpop.xlane.xlu0 %1031 }
 0x944   :  { %v1036_v35 = vmul.f32 0.032258064, %v1032_v32 }
 0x946   :  { %2283 = vrsqrt.f32 %v1036_v35  ;;  %vm1045_vm5 = vcmp.eq.f32.partialorder %v1036_v35, inf  ;;  %v1048_v55 = vand.u32 2147483648, %v1036_v35  ;;  %vm1047_vm6 = vcmp.eq.f32.partialorder %v1036_v35, 0.0 }
 0x94b   :  { %v1035_v38 = vpop.xlane.xlu0 %1034 }
 0x94c   :  { %v2284_v39 = vpop.eup %2283  ;;  %v1037_v41 = vmul.f32 0.032258064, %v1035_v38 }
 0x94d   :  { %v1039_v43 = vmul.f32 %v2284_v39, %v1036_v35 }
 0x94e   :  { %2285 = vrsqrt.f32 %v1037_v41  ;;  %vm1057_vm7 = vcmp.eq.f32.partialorder %v1037_v41, inf  ;;  %v1060_v61 = vand.u32 2147483648, %v1037_v41  ;;  %vm1059_vm8 = vcmp.eq.f32.partialorder %v1037_v41, 0.0 }
 0x94f   :  { %v1040_v44 = vmul.f32 %v2284_v39, %v1039_v43 }
 0x951   :  { %v1041_v45 = vmul.f32 0.5, %v1040_v44 }
 0x953   :  { %v1042_v46 = vsub.f32 1.5, %v1041_v45 }
 0x954   :  { %v2286_v49 = vpop.eup %2285 }
 0x955   :  { %v1043_v50 = vmul.f32 %v2284_v39, %v1042_v46  ;;  %v1051_v52 = vmul.f32 %v2286_v49, %v1037_v41 }
 0x957   :  { %v1044_v53 = vmul.f32 %v1043_v50, %v1036_v35  ;;  %v1052_v54 = vmul.f32 %v2286_v49, %v1051_v52 }
 0x959   :  { %v1046_v56 = vsel %vm1045_vm5, %v1036_v35, %v1044_v53  ;;  %v1053_v51 = vmul.f32 0.5, %v1052_v54 }
 0x95a   :  { %v1049_v57 = vsel %vm1047_vm6, %v1048_v55, %v1046_v56 }
 0x95b   :  { %v1067_v48 = vadd.f32 1e-06, %v1049_v57  ;;  %v1054_v33 = vsub.f32 1.5, %v1053_v51 }
 0x95d   :  { %2287 = vrcp.f32 %v1067_v48  ;;  %v1055_v58 = vmul.f32 %v2286_v49, %v1054_v33  ;;  %v1080_v29 = vand.u32 2147483648, %v1067_v48  ;;  %vm1074_vm10 = vweird.f32 %v1067_v48 }
 0x95e   :  { %v1078_v7 = vand.u32 2147483647, %v1067_v48 }
 0x95f   :  { %v1056_v60 = vmul.f32 %v1055_v58, %v1037_v41  ;;  %v1081_v15 = vor.u32 1.1754944e-38, %v1080_v29 }
 0x960   :  { %vm1079_vm12 = vcmp.eq.f32.partialorder %v1078_v7, 8.507059e+37 }
 0x961   :  { %v1058_v62 = vsel %vm1057_vm7, %v1037_v41, %v1056_v60 }
 0x962   :  { %v1061_v0 = vsel %vm1059_vm8, %v1060_v61, %v1058_v62 }
 0x963   :  { %v2288_v2 = vpop.eup %2287  ;;  %v1068_v3 = vadd.f32 1e-06, %v1061_v0 }
 0x964   :  { %v1070_v1 = vmul.f32 %v2288_v2, %v1067_v48  ;;  %vm1075_vm9 = vweird.f32 %v2288_v2 }
 0x965   :  { %2289 = vrcp.f32 %v1068_v3  ;;  %vm1076_vm11 = vmor %vm1074_vm10, %vm1075_vm9  ;;  %v1095_v16 = vand.u32 2147483648, %v1068_v3  ;;  %v1093_v19 = vand.u32 2147483647, %v1068_v3  ;;  %vm1089_vm3 = vweird.f32 %v1068_v3 }
 0x966   :  { %v1071_v5 = vsub.f32 1.0, %v1070_v1 }
 0x967   :  { %v1096_v23 = vor.u32 1.1754944e-38, %v1095_v16  ;;  %vm1094_vm6 = vcmp.eq.f32.partialorder %v1093_v19, 8.507059e+37 }
 0x968   :  { %v1072_v63 = vmul.f32 %v2288_v2, %v1071_v5 }
 0x96a   :  { %v1073_v4 = vadd.f32 %v2288_v2, %v1072_v63 }
 0x96b   :  { %v2290_v6 = vpop.eup %2289 }
 0x96c   :  { %v1085_v8 = vmul.f32 %v2290_v6, %v1068_v3  ;;  %v1077_v12 = vsel %vm1076_vm11, %v2288_v2, %v1073_v4  ;;  %vm1090_vm13 = vweird.f32 %v2290_v6 }
 0x96d   :  { %v1082_v20 = vsel %vm1079_vm12, %v1081_v15, %v1077_v12  ;;  %vm1091_vm5 = vmor %vm1089_vm3, %vm1090_vm13 }
 0x96e   :  { %v1086_v14 = vsub.f32 1.0, %v1085_v8  ;;  %v1083_v28 = vmul.f32 %v1082_v20, %v1065_v18 }
 0x970   :  { %v1087_v17 = vmul.f32 %v2290_v6, %v1086_v14  ;;  %v1102_v26 = vadd.f32 %v2224_v13, %v1083_v28 }
 0x972   :  { %v1088_v22 = vadd.f32 %v2290_v6, %v1087_v17 }
 0x974   :  { %v1092_v25 = vsel %vm1091_vm5, %v2290_v6, %v1088_v22 }
 0x975   :  { %v1097_v40 = vsel %vm1094_vm6, %v1096_v23, %v1092_v25 }
 0x976   :  { %v1098_v47 = vmul.f32 %v1097_v40, %v1066_v24 }
 0x978   :  { %v1103_v59 = vadd.f32 %v2224_v13, %v1098_v47 }
 0x97a   :  { %v1104_v42 = vpack.c.bf16 %v1103_v59, %v1102_v26 }
 0x97c   :  { %2076 = vmatmul.msk.bf16.vlgmr.msrb.gmra.mxu0 %vm139_vm0, %v1104_v42 }
 0x9f9   :  { %v1139_v34 = vpop.f32.mrf.mxu0 }
 0x9fa   :  { %v1140_v32 = vadd.f32 %v2225_v30, %v1139_v34 }
 0x9fc   :  { %1151 = vrot.lane.b32.xlu0 %v1140_v32, %s2501_s23  ;;  %1148 = vrot.lane.b32.xlu2 %v1140_v32, %s2503_s3  ;;  %v1164_v2 = vpack.c.bf16 %v1140_v32, %v1140_v32 }
 0x9fd   :  { %1145 = vrot.lane.b32.xlu1 %v1140_v32, %s2502_s24 }
 0x9fe   :  { %v1173_v1 = vunpack.c.l.b16 %v1164_v2 }
 0xa00   :  { %v2939_v63 = vpack.c.b16 %v1173_v1, %v1173_v1 }
 0xa01   :  { %v1141_v31 = vpop.f32.mrf.mxu0 }
 0xa02   :  { %v1142_v35 = vadd.f32 %v2225_v30, %v1141_v31 }
 0xa04   :  { %1155 = vrot.lane.b32.xlu0 %v1142_v35, %s2502_s24  ;;  %1161 = vrot.lane.b32.xlu2 %v1142_v35, %s2501_s23  ;;  %v1168_v0 = vpack.c.bf16 %v1142_v35, %v1142_v35 }
 0xa05   :  { %1158 = vrot.lane.b32.xlu1 %v1142_v35, %s2503_s3 }
 0xa06   :  { %v1269_v3 = vunpack.c.l.b16 %v1168_v0 }
 0xa08   :  { %v2937_v5 = vpack.c.b16 %v1269_v3, %v1269_v3 }
 0xa56   :  { %v1149_v36 = vpop.permute.xlu2 %1148 }
 0xa57   :  { %v1166_v37 = vpack.c.bf16 %v1149_v36, %v1149_v36 }
 0xa59   :  { %v1221_v38 = vunpack.c.l.b16 %v1166_v37 }
 0xa5b   :  { %v2913_v39 = vpack.c.b16 %v1221_v38, %v1221_v38 }
 0xa5d   :  { %1223 = vrot.lane.b32.xlu1 %v2913_v39, %s2504_s27 }
 0xa5e   :  { %v1162_v45 = vpop.permute.xlu2 %1161 }
 0xa5f   :  { %v1171_v52 = vpack.c.bf16 %v1162_v45, %v1162_v45 }
 0xa61   :  { %v1341_v56 = vunpack.c.l.b16 %v1171_v52 }
 0xa63   :  { %v2925_v60 = vpack.c.b16 %v1341_v56, %v1341_v56 }
 0xa6e   :  { %v1152_v41 = vpop.permute.xlu0 %1151 }
 0xa6f   :  { %v1167_v43 = vpack.c.bf16 %v1152_v41, %v1152_v41  ;;  %v1146_v44 = vpop.permute.xlu1 %1145 }
 0xa70   :  { %v1165_v46 = vpack.c.bf16 %v1146_v44, %v1146_v44 }
 0xa71   :  { %v1245_v49 = vunpack.c.l.b16 %v1167_v43 }
 0xa72   :  { %v1197_v50 = vunpack.c.l.b16 %v1165_v46 }
 0xa73   :  { %v2917_v53 = vpack.c.b16 %v1245_v49, %v1245_v49 }
 0xa74   :  { %v2919_v54 = vpack.c.b16 %v1197_v50, %v1197_v50 }
 0xa75   :  { %1247 = vrot.lane.b32.xlu2 %v2917_v53, %s2504_s27 }
 0xa76   :  { %1199 = vrot.lane.b32.xlu0 %v2919_v54, %s2504_s27  ;;  %v1156_v55 = vpop.permute.xlu0 %1155 }
 0xa77   :  { %v1169_v51 = vpack.c.bf16 %v1156_v55, %v1156_v55  ;;  %v1159_v57 = vpop.permute.xlu1 %1158 }
 0xa78   :  { %v1170_v48 = vpack.c.bf16 %v1159_v57, %v1159_v57 }
 0xa79   :  { %v1293_v33 = vunpack.c.l.b16 %v1169_v51 }
 0xa7a   :  { %v1317_v58 = vunpack.c.l.b16 %v1170_v48 }
 0xa7b   :  { %v2927_v61 = vpack.c.b16 %v1293_v33, %v1293_v33 }
 0xa7c   :  { %v2929_v62 = vpack.c.b16 %v1317_v58, %v1317_v58 }
 0xa7d   :  { %1343 = vrot.lane.b32.xlu2 %v2925_v60, %s2504_s27 }
 0xa7e   :  { %1295 = vrot.lane.b32.xlu0 %v2927_v61, %s2504_s27  ;;  %1319 = vrot.lane.b32.xlu1 %v2929_v62, %s2504_s27 }
 0xa86   :  { %1271 = vrot.lane.b32.xlu1 %v2937_v5, %s2504_s27  ;;  %1175 = vrot.lane.b32.xlu0 %v2939_v63, %s2504_s27 }
 0xacf   :  { %v1248_v4 = vpop.permute.xlu2 %1247  ;;  %v1224_v6 = vpop.permute.xlu1 %1223 }
 0xad0   :  { %v1253_v29 = vsel %vm304_vm14, %v1248_v4, 0  ;;  %v1229_v7 = vsel %vm304_vm14, %v1224_v6, 0 }
 0xad1   :  { %1238 = vmatpush.bf16.xpose.msrb.mxu3 %v1229_v7  ;;  %1262 = vmatpush.bf16.xpose.msra.mxu0 %v1253_v29 }
 0xad7   :  { %v1344_v8 = vpop.permute.xlu2 %1343 }
 0xad8   :  { %v1349_v9 = vsel %vm304_vm14, %v1344_v8, 0  ;;  %2079 = vmatmul.msk.bf16.vlgmr.msrb.gmra.mxu3 %vm304_vm14, %v1166_v37  ;;  %2080 = vmatmul.msk.bf16.vlgmr.msra.gmra.mxu0 %vm304_vm14, %v1167_v43 }
 0xad9   :  { %1358 = vmatpush.bf16.xpose.msrb.mxu0 %v1349_v9 }
 0xae8   :  { %v1200_v12 = vpop.permute.xlu0 %1199  ;;  %2084 = vmatmul.msk.bf16.vlgmr.msrb.gmra.mxu0 %vm304_vm14, %v1171_v52 }
 0xae9   :  { %v1205_v14 = vsel %vm304_vm14, %v1200_v12, 0 }
 0xaea   :  { %1214 = vmatpush.bf16.xpose.msrb.mxu2 %v1205_v14 }
 0xaf0   :  { %v1296_v15 = vpop.permute.xlu0 %1295  ;;  %v1320_v16 = vpop.permute.xlu1 %1319 }
 0xaf1   :  { %v1301_v17 = vsel %vm304_vm14, %v1296_v15, 0  ;;  %v1325_v19 = vsel %vm304_vm14, %v1320_v16, 0  ;;  %2078 = vmatmul.msk.bf16.vlgmr.msrb.gmra.mxu2 %vm304_vm14, %v1165_v46 }
 0xaf2   :  { %1310 = vmatpush.bf16.xpose.msra.mxu2 %v1301_v17  ;;  %1334 = vmatpush.bf16.xpose.msra.mxu3 %v1325_v19 }
 0xaf8   :  { %v1272_v20 = vpop.permute.xlu1 %1271  ;;  %v1176_v18 = vpop.permute.xlu0 %1175 }
 0xaf9   :  { %v1277_v22 = vsel %vm304_vm14, %v1272_v20, 0  ;;  %v1181_v23 = vsel %vm304_vm14, %v1176_v18, 0  ;;  %2083 = vmatmul.msk.bf16.vlgmr.msra.gmra.mxu3 %vm304_vm14, %v1170_v48 }
 0xafa   :  { %1190 = vmatpush.bf16.xpose.msrb.mxu1 %v1181_v23 }
 0xb01   :  { %2077 = vmatmul.msk.bf16.vlgmr.msrb.gmra.mxu1 %vm304_vm14, %v1164_v2  ;;  %2082 = vmatmul.msk.bf16.vlgmr.msra.gmra.mxu2 %vm304_vm14, %v1169_v51 }
 0xb02   :  { %1286 = vmatpush.bf16.xpose.msra.mxu1 %v1277_v22 }
 0xb11   :  { %2081 = vmatmul.msk.bf16.vlgmr.msra.gmra.mxu1 %vm304_vm14, %v1168_v0 }
 0xb55   :  { %v1264_v24 = vpop.f32.mrf.mxu0 }
 0xb56   :  { %v1265_v28 = vadd.f32 %v1264_v24, %v2707_v11 }
 0xb58   :  { %v1373_v25 = vsel %vm304_vm14, %v1265_v28, -inf }
 0xb59   :  { %1374 = vmax.xlane.f32.xlu1 %v1373_v25 }
 0xb5b   :  { %v1240_v13 = vpop.f32.mrf.mxu3 }
 0xb5c   :  { %v1241_v40 = vadd.f32 %v1240_v13, %v2707_v11 }
 0xb5d   :  { %v1266_v47 = vpop.f32.mrf.mxu0 }
 0xb5e   :  { %v1370_v26 = vsel %vm304_vm14, %v1241_v40, -inf }
 0xb5f   :  { %1371 = vmax.xlane.f32.xlu0 %v1370_v26 }
 0xb63   :  { %v1242_v59 = vpop.f32.mrf.mxu3 }
 0xb65   :  { %v1360_v42 = vpop.f32.mrf.mxu0 }
 0xb66   :  { %v1361_v30 = vadd.f32 %v1360_v42, %v2707_v11 }
 0xb68   :  { %v1385_v34 = vsel %vm304_vm14, %v1361_v30, -inf }
 0xb69   :  { %1386 = vmax.xlane.f32.xlu1 %v1385_v34 }
 0xb6d   :  { %v1362_v32 = vpop.f32.mrf.mxu0 }
 0xb74   :  { %v1216_v31 = vpop.f32.mrf.mxu2 }
 0xb75   :  { %v1217_v49 = vadd.f32 %v1216_v31, %v2707_v11 }
 0xb77   :  { %v1367_v52 = vsel %vm304_vm14, %v1217_v49, -inf }
 0xb7c   :  { %v1218_v35 = vpop.f32.mrf.mxu2  ;;  %v1336_v36 = vpop.f32.mrf.mxu3 }
 0xb7d   :  { %v2968_v37 = vadd.f32 %v1336_v36, %v2707_v11 }
 0xb7e   :  { %v1192_v38 = vpop.f32.mrf.mxu1 }
 0xb7f   :  { %v2971_v41 = vadd.f32 %v1192_v38, %v2707_v11  ;;  %v1382_v43 = vsel %vm304_vm14, %v2968_v37, -inf }
 0xb80   :  { %1383 = vmax.xlane.f32.xlu0 %v1382_v43 }
 0xb81   :  { %v1364_v44 = vsel %vm304_vm14, %v2971_v41, -inf }
 0xb82   :  { %1365 = vmax.xlane.f32.xlu2 %v1364_v44 }
 0xb84   :  { %v1312_v45 = vpop.f32.mrf.mxu2  ;;  %v1338_v46 = vpop.f32.mrf.mxu3 }
 0xb85   :  { %v1313_v56 = vadd.f32 %v1312_v45, %v2707_v11 }
 0xb86   :  { %v1194_v50 = vpop.f32.mrf.mxu1 }
 0xb87   :  { %v1379_v33 = vsel %vm304_vm14, %v1313_v56, -inf }
 0xb8a   :  { %1368 = vmax.xlane.f32.xlu2 %v1367_v52 }
 0xb8c   :  { %v1314_v55 = vpop.f32.mrf.mxu2 }
 0xb8e   :  { %v1288_v51 = vpop.f32.mrf.mxu1 }
 0xb8f   :  { %v1289_v57 = vadd.f32 %v1288_v51, %v2707_v11 }
 0xb91   :  { %v1376_v48 = vsel %vm304_vm14, %v1289_v57, -inf }
 0xb92   :  { %1377 = vmax.xlane.f32.xlu1 %v1376_v48  ;;  %1380 = vmax.xlane.f32.xlu2 %v1379_v33 }
 0xb96   :  { %v1290_v58 = vpop.f32.mrf.mxu1 }
 0xbab   :  { %1523 = vrot.lane.b32.xlu1 %v2917_v53, %s2505_s29 }
 0xbcc   :  { %v1375_v0 = vpop.xlane.xlu1 %1374 }
 0xbcd   :  { %v1391_v2 = vsub.f32 %v1265_v28, %v1375_v0 }
 0xbcf   :  { %v1402_v3 = vmul.f32 1.442695, %v1391_v2 }
 0xbd1   :  { %2291 = vpow2.f32 %v1402_v3 }
 0xbd2   :  { %v1372_v1 = vpop.xlane.xlu0 %1371 }
 0xbd3   :  { %v1390_v4 = vsub.f32 %v1241_v40, %v1372_v1 }
 0xbd5   :  { %v1400_v6 = vmul.f32 1.442695, %v1390_v4 }
 0xbd7   :  { %v2985_v29 = vpop.eup %2291  ;;  %2293 = vpow2.f32 %v1400_v6 }
 0xbd8   :  { %v1421_v11 = vsel %vm304_vm14, %v2985_v29, 0.0 }
 0xbd9   :  { %1422 = vadd.xlane.f32.xlu2 %v1421_v11 }
 0xbdc   :  { %v1387_v15 = vpop.xlane.xlu1 %1386 }
 0xbdd   :  { %v2989_v7 = vpop.eup %2293  ;;  %v1395_v20 = vsub.f32 %v1361_v30, %v1387_v15 }
 0xbde   :  { %v1418_v8 = vsel %vm304_vm14, %v2989_v7, 0.0 }
 0xbdf   :  { %1419 = vadd.xlane.f32.xlu1 %v1418_v8  ;;  %v1410_v23 = vmul.f32 1.442695, %v1395_v20 }
 0xbf1   :  { %1502 = vrot.lane.b32.xlu2 %v2913_v39, %s2505_s29 }
 0xbf3   :  { %v1384_v34 = vpop.xlane.xlu0 %1383 }
 0xbf4   :  { %v1394_v32 = vsub.f32 %v2968_v37, %v1384_v34 }
 0xbf5   :  { %v1366_v53 = vpop.xlane.xlu2 %1365 }
 0xbf6   :  { %v1408_v31 = vmul.f32 1.442695, %v1394_v32 }
 0xbfd   :  { %v1369_v9 = vpop.xlane.xlu2 %1368 }
 0xbfe   :  { %v1389_v12 = vsub.f32 %v1217_v49, %v1369_v9 }
 0xc00   :  { %v1398_v14 = vmul.f32 1.442695, %v1389_v12 }
 0xc02   :  { %2295 = vpow2.f32 %v1398_v14 }
 0xc05   :  { %v1381_v16 = vpop.xlane.xlu2 %1380  ;;  %v1378_v24 = vpop.xlane.xlu1 %1377 }
 0xc06   :  { %v1393_v17 = vsub.f32 %v1313_v56, %v1381_v16  ;;  %v1392_v28 = vsub.f32 %v1289_v57, %v1378_v24 }
 0xc08   :  { %v2296_v19 = vpop.eup %2295  ;;  %v1406_v18 = vmul.f32 1.442695, %v1393_v17  ;;  %v1404_v13 = vmul.f32 1.442695, %v1392_v28 }
 0xc09   :  { %v1415_v22 = vsel %vm304_vm14, %v2296_v19, 0.0 }
 0xc0a   :  { %1416 = vadd.xlane.f32.xlu0 %v1415_v22  ;;  %2297 = vpow2.f32 %v1406_v18 }
 0xc0b   :  { %2299 = vpow2.f32 %v1410_v23 }
 0xc0c   :  { %2301 = vpow2.f32 %v1404_v13 }
 0xc0d   :  { %2303 = vpow2.f32 %v1408_v31 }
 0xc10   :  { %v2298_v39 = vpop.eup %2297 }
 0xc11   :  { %v1427_v25 = vsel %vm304_vm14, %v2298_v39, 0.0  ;;  %v2997_v40 = vpop.eup %2299 }
 0xc12   :  { %1428 = vadd.xlane.f32.xlu1 %v1427_v25  ;;  %v1433_v47 = vsel %vm304_vm14, %v2997_v40, 0.0  ;;  %v3001_v59 = vpop.eup %2301 }
 0xc13   :  { %v1424_v30 = vsel %vm304_vm14, %v3001_v59, 0.0  ;;  %v2304_v36 = vpop.eup %2303 }
 0xc1a   :  { %1434 = vadd.xlane.f32.xlu2 %v1433_v47 }
 0xc1d   :  { %v1524_v26 = vpop.permute.xlu1 %1523 }
 0xc1e   :  { %v1529_v42 = vsel %vm593_vm15, %v1524_v26, 0  ;;  %1481 = vrot.lane.b32.xlu0 %v2919_v54, %s2505_s29  ;;  %v1388_v54 = vsub.f32 %v2971_v41, %v1366_v53 }
 0xc1f   :  { %1538 = vmatpush.bf16.msra.mxu0 %v1529_v42 }
 0xc20   :  { %v1396_v35 = vmul.f32 1.442695, %v1388_v54 }
 0xc22   :  { %1425 = vadd.xlane.f32.xlu2 %v1424_v30  ;;  %2305 = vpow2.f32 %v1396_v35 }
 0xc28   :  { %v2306_v38 = vpop.eup %2305 }
 0xc29   :  { %v1412_v37 = vsel %vm304_vm14, %v2306_v38, 0.0 }
 0xc2b   :  { %1565 = vrot.lane.b32.xlu1 %v2927_v61, %s2505_s29  ;;  %v1430_v61 = vsel %vm304_vm14, %v2304_v36, 0.0 }
 0xc33   :  { %1586 = vrot.lane.b32.xlu1 %v2929_v62, %s2505_s29 }
 0xc3b   :  { %1607 = vrot.lane.b32.xlu1 %v2925_v60, %s2505_s29 }
 0xc43   :  { %1460 = vrot.lane.b32.xlu1 %v2939_v63, %s2505_s29 }
 0xc48   :  { %1431 = vadd.xlane.f32.xlu0 %v1430_v61 }
 0xc4c   :  { %v1423_v62 = vpop.xlane.xlu2 %1422 }
 0xc4d   :  { %2307 = vrcp.f32 %v1423_v62 }
 0xc50   :  { %1413 = vadd.xlane.f32.xlu0 %v1412_v37 }
 0xc52   :  { %v1420_v43 = vpop.xlane.xlu1 %1419 }
 0xc53   :  { %v2308_v60 = vpop.eup %2307  ;;  %2309 = vrcp.f32 %v1420_v43 }
 0xc54   :  { %v1447_v41 = vmul.f32 %v2308_v60, %v2985_v29  ;;  %v1503_v44 = vpop.permute.xlu2 %1502 }
 0xc55   :  { %v1508_v45 = vsel %vm593_vm15, %v1503_v44, 0  ;;  %v2161_v44 = vld [vmem:[%s3148_s6 + $0x18] sm:$0xff] }
 0xc56   :  { %v1455_v46 = vpack.c.bf16 %v1447_v41, %v1447_v41  ;;  %1517 = vmatpush.bf16.msrb.mxu3 %v1508_v45  ;;  %v2160_v45 = vld [vmem:[%s3148_s6 + $0x10] sm:$0xff]  ;;  %s1987_s6 = sshll.u32 %s3158_s16, 4  ;;  %s1988_s6 = int_to_ptr.hbm [resolvable:$true] %s1987_s6 }
 0xc58   :  { %2088 = vmatmul.msk.bf16.vlgmr.msra.gmra.mxu0 %vm304_vm14, %v1455_v46 }
 0xc59   :  { %v2310_v63 = vpop.eup %2309 }
 0xc5a   :  { %v1446_v49 = vmul.f32 %v2310_v63, %v2989_v7 }
 0xc5c   :  { %v1454_v50 = vpack.c.bf16 %v1446_v49, %v1446_v49 }
 0xc5e   :  { %2087 = vmatmul.msk.bf16.vlgmr.msrb.gmra.mxu3 %vm304_vm14, %v1454_v50 }
 0xc64   :  { %1544 = vrot.lane.b32.xlu0 %v2937_v5, %s2505_s29 }
 0xc7d   :  { %v1417_v52 = vpop.xlane.xlu0 %1416 }
 0xc7e   :  { %2311 = vrcp.f32 %v1417_v52 }
 0xc84   :  { %v2312_v55 = vpop.eup %2311 }
 0xc85   :  { %v1445_v56 = vmul.f32 %v2312_v55, %v2296_v19  ;;  %v1429_v33 = vpop.xlane.xlu1 %1428 }
 0xc86   :  { %2313 = vrcp.f32 %v1429_v33 }
 0xc87   :  { %v1453_v48 = vpack.c.bf16 %v1445_v56, %v1445_v56 }
 0xc8c   :  { %v2314_v58 = vpop.eup %2313 }
 0xc8d   :  { %v1449_v2 = vmul.f32 %v2314_v58, %v2298_v39  ;;  %v1435_v5 = vpop.xlane.xlu2 %1434 }
 0xc8e   :  { %2315 = vrcp.f32 %v1435_v5 }
 0xc8f   :  { %v1457_v1 = vpack.c.bf16 %v1449_v2, %v1449_v2 }
 0xc90   :  { %v1482_v51 = vpop.permute.xlu0 %1481 }
 0xc91   :  { %v1487_v57 = vsel %vm593_vm15, %v1482_v51, 0 }
 0xc92   :  { %1496 = vmatpush.bf16.msrb.mxu2 %v1487_v57 }
 0xc94   :  { %v2316_v29 = vpop.eup %2315 }
 0xc95   :  { %2086 = vmatmul.msk.bf16.vlgmr.msrb.gmra.mxu2 %vm304_vm14, %v1453_v48  ;;  %v1451_v11 = vmul.f32 %v2316_v29, %v2997_v40  ;;  %v1426_v22 = vpop.xlane.xlu2 %1425 }
 0xc97   :  { %v1459_v53 = vpack.c.bf16 %v1451_v11, %v1451_v11 }
 0xc9d   :  { %v1566_v0 = vpop.permute.xlu1 %1565 }
 0xc9e   :  { %v1571_v3 = vsel %vm593_vm15, %v1566_v0, 0 }
 0xc9f   :  { %1580 = vmatpush.bf16.msra.mxu2 %v1571_v3 }
 0xca5   :  { %2090 = vmatmul.msk.bf16.vlgmr.msra.gmra.mxu2 %vm304_vm14, %v1457_v1  ;;  %v1587_v4 = vpop.permute.xlu1 %1586  ;;  %v2226_v1 = vld [vmem:[%s3149_s7 + $0x1] ss:$0 sm:$0xff] }
 0xca6   :  { %v1592_v6 = vsel %vm593_vm15, %v1587_v4, 0 }
 0xca7   :  { %1601 = vmatpush.bf16.msra.mxu3 %v1592_v6 }
 0xcad   :  { %v1608_v7 = vpop.permute.xlu1 %1607 }
 0xcae   :  { %v1613_v8 = vsel %vm593_vm15, %v1608_v7, 0 }
 0xcaf   :  { %1622 = vmatpush.bf16.msrb.mxu0 %v1613_v8 }
 0xcb2   :  { %2092 = vmatmul.msk.bf16.vlgmr.msrb.gmra.mxu0 %vm304_vm14, %v1459_v53 }
 0xcb5   :  { %v1461_v9 = vpop.permute.xlu1 %1460 }
 0xcb6   :  { %v1466_v12 = vsel %vm593_vm15, %v1461_v9, 0 }
 0xcb7   :  { %1475 = vmatpush.bf16.msrb.mxu1 %v1466_v12 }
 0xcbb   :  { %v1432_v14 = vpop.xlane.xlu0 %1431 }
 0xcbc   :  { %2317 = vrcp.f32 %v1432_v14 }
 0xcc2   :  { %v2318_v15 = vpop.eup %2317 }
 0xcc3   :  { %v1450_v16 = vmul.f32 %v2318_v15, %v2304_v36  ;;  %v1414_v17 = vpop.xlane.xlu0 %1413 }
 0xcc4   :  { %2319 = vrcp.f32 %v1414_v17 }
 0xcc5   :  { %v1458_v19 = vpack.c.bf16 %v1450_v16, %v1450_v16  ;;  %2321 = vrcp.f32 %v1426_v22 }
 0xcc7   :  { %2091 = vmatmul.msk.bf16.vlgmr.msra.gmra.mxu3 %vm304_vm14, %v1458_v19 }
 0xcca   :  { %v2320_v20 = vpop.eup %2319 }
 0xccb   :  { %v1444_v18 = vmul.f32 %v2320_v20, %v2306_v38  ;;  %v2322_v28 = vpop.eup %2321 }
 0xccc   :  { %v1448_v13 = vmul.f32 %v2322_v28, %v3001_v59  ;;  %v2162_v28 = vld [vmem:[%s3152_s10 + $0x10] sm:$0xff] }
 0xccd   :  { %v1452_v23 = vpack.c.bf16 %v1444_v18, %v1444_v18 }
 0xcce   :  { %v1456_v40 = vpack.c.bf16 %v1448_v13, %v1448_v13 }
 0xccf   :  { %2085 = vmatmul.msk.bf16.vlgmr.msrb.gmra.mxu1 %vm304_vm14, %v1452_v23 }
 0xcd5   :  { %v1540_v24 = vpop.f32.mrf.mxu0 }
 0xcd6   :  { %v1545_v39 = vpop.permute.xlu0 %1544 }
 0xcd7   :  { %v1550_v25 = vsel %vm593_vm15, %v1545_v39, 0 }
 0xcd8   :  { %1559 = vmatpush.bf16.msra.mxu1 %v1550_v25 }
 0xcdc   :  { %1690 = vmatpush.bf16.msrb.mxu1 %v2161_v44 }
 0xcdd   :  { %v1542_v47 = vpop.f32.mrf.mxu0 }
 0xcdf   :  { %2089 = vmatmul.msk.bf16.vlgmr.msra.gmra.mxu1 %vm304_vm14, %v1456_v40 }
 0xce0   :  { %1691 = vmatpush.bf16.msrb.mxu1 %v2160_v45 }
 0xce1   :  { %v1519_v26 = vpop.f32.mrf.mxu3 }
 0xce9   :  { %v1521_v42 = vpop.f32.mrf.mxu3 }
 0xd18   :  { %v1498_v30 = vpop.f32.mrf.mxu2 }
 0xd20   :  { %v1500_v34 = vpop.f32.mrf.mxu2 }
 0xd28   :  { %v1582_v32 = vpop.f32.mrf.mxu2 }
 0xd29   :  { %v2200_v31 = vpack.i.bf16 %v1582_v32, %v1498_v30 }
 0xd2b   :  { %2201 = vrot.lane.b32.xlu1 %v2200_v31, %s2497_s26 }
 0xd2f   :  { %v1624_v54 = vpop.f32.mrf.mxu0 }
 0xd30   :  { %v1584_v35 = vpop.f32.mrf.mxu2  ;;  %v2210_v36 = vpack.i.bf16 %v1624_v54, %v1540_v24  ;;  %v2163_v24 = vld [vmem:[%s3152_s10 + $0x18] sm:$0xff] }
 0xd31   :  { %1822 = vmatpush.bf16.msrb.mxu2 %v2163_v24 }
 0xd33   :  { %2211 = vrot.lane.b32.xlu1 %v2210_v36, %s2506_s0 }
 0xd35   :  { %1823 = vmatpush.bf16.msrb.mxu2 %v2162_v28 }
 0xd37   :  { %v1626_v61 = vpop.f32.mrf.mxu0 }
 0xd4a   :  { %v1603_v38 = vpop.f32.mrf.mxu3 }
 0xd4b   :  { %v2205_v59 = vpack.i.bf16 %v1603_v38, %v1519_v26 }
 0xd4c   :  { %v1477_v62 = vpop.f32.mrf.mxu1 }
 0xd4d   :  { %2206 = vrot.lane.b32.xlu2 %v2205_v59, %s2493_s1 }
 0xd52   :  { %v1605_v37 = vpop.f32.mrf.mxu3 }
 0xd54   :  { %v1479_v43 = vpop.f32.mrf.mxu1 }
 0xd5c   :  { %v1561_v60 = vpop.f32.mrf.mxu1 }
 0xd64   :  { %v1563_v41 = vpop.f32.mrf.mxu1 }
 0xd9d   :  { %v2202_v46 = vpop.permute.xlu1 %2201 }
 0xd9e   :  { %v2204_v63 = vunpack.i.h.bf16 %v2202_v46  ;;  %v2203_v49 = vunpack.i.l.bf16 %v2202_v46 }
 0xda0   :  { %v1640_v51 = vsel %vm304_vm14, %v1477_v62, %v2203_v49  ;;  %v1655_v57 = vsel %vm304_vm14, %v1561_v60, %v2204_v63 }
 0xda5   :  { %v2212_v50 = vpop.permute.xlu1 %2211 }
 0xda6   :  { %v2214_v48 = vunpack.i.h.bf16 %v2212_v50  ;;  %v2213_v33 = vunpack.i.l.bf16 %v2212_v50 }
 0xda7   :  { %v2207_v52 = vpop.permute.xlu2 %2206 }
 0xda8   :  { %v2209_v55 = vunpack.i.h.bf16 %v2207_v52  ;;  %v2208_v56 = vunpack.i.l.bf16 %v2207_v52 }
 0xdaa   :  { %v1641_v58 = vsel %vm770_vm1, %v1640_v51, %v2208_v56  ;;  %v1656_v0 = vsel %vm770_vm1, %v1655_v57, %v2209_v55 }
 0xdab   :  { %v1642_v2 = vsel %vm772_vm2, %v1641_v58, %v2213_v33  ;;  %v1657_v3 = vsel %vm772_vm2, %v1656_v0, %v2214_v48  ;;  %v2227_v48 = vld [vmem:[%s3150_s8 + $0x1] ss:$0 sm:$0xff] }
 0xdac   :  { %v1658_v5 = vpack.c.bf16 %v1657_v3, %v1642_v2 }
 0xdae   :  { %2106 = vmatmul.msk.bf16.vlgmr.msrb.gmra.mxu1 %vm139_vm0, %v1658_v5 }
 0xe2b   :  { %v1693_v4 = vpop.f32.mrf.mxu1 }
 0xe2c   :  { %v1694_v6 = vadd.f32 %v2226_v1, %v1693_v4 }
 0xe2e   :  { %v3061_v29 = vadd.f32 %v1694_v6, %v2872_v21 }
 0xe30   :  { %v1704_v11 = vsel %vm139_vm0, %v3061_v29, 0.0 }
 0xe31   :  { %1705 = vadd.xlane.f32.xlu0 %v1704_v11 }
 0xe33   :  { %v1695_v7 = vpop.f32.mrf.mxu1 }
 0xe34   :  { %v1696_v8 = vadd.f32 %v2226_v1, %v1695_v7 }
 0xe36   :  { %v3066_v53 = vadd.f32 %v1696_v8, %v2877_v27 }
 0xe38   :  { %v1707_v9 = vsel %vm139_vm0, %v3066_v53, 0.0 }
 0xe39   :  { %1708 = vadd.xlane.f32.xlu1 %v1707_v9 }
 0xea4   :  { %v1706_v12 = vpop.xlane.xlu0 %1705 }
 0xea5   :  { %v1710_v14 = vmul.f32 %v1706_v12, %v2625_v10  ;;  %v2228_v12 = vld [vmem:[#allocation10 + $0x1] ss:$0 sm:$0xff] }
 0xea7   :  { %v3072_v15 = vsub.f32 %v3061_v29, %v1710_v14 }
 0xea9   :  { %v1714_v21 = vmul.f32 %v3072_v15, %v3072_v15  ;;  %v1751_v4 = vmul.f32 %v2227_v48, %v3072_v15  ;;  %v2167_v15 = vld [vmem:[%s3154_s12 + $0x38] sm:$0xff] }
 0xeaa   :  { %1878 = vmatpush.bf16.msrb.mxu3 %v2167_v15 }
 0xeab   :  { %v1716_v16 = vsel %vm139_vm0, %v1714_v21, 0.0 }
 0xeac   :  { %v1709_v17 = vpop.xlane.xlu1 %1708  ;;  %1717 = vadd.xlane.f32.xlu2 %v1716_v16 }
 0xead   :  { %v1711_v27 = vmul.f32 %v1709_v17, %v2625_v10 }
 0xeaf   :  { %v3079_v19 = vsub.f32 %v3066_v53, %v1711_v27 }
 0xeb1   :  { %v1715_v20 = vmul.f32 %v3079_v19, %v3079_v19  ;;  %v1752_v7 = vmul.f32 %v2227_v48, %v3079_v19  ;;  %v2166_v19 = vld [vmem:[%s3154_s12 + $0x30] sm:$0xff] }
 0xeb2   :  { %1879 = vmatpush.bf16.msrb.mxu3 %v2166_v19 }
 0xeb3   :  { %v1719_v18 = vsel %vm139_vm0, %v1715_v20, 0.0  ;;  %v2165_v20 = vld [vmem:[%s3154_s12 + $0x28] sm:$0xff] }
 0xeb4   :  { %1720 = vadd.xlane.f32.xlu0 %v1719_v18  ;;  %v2164_v18 = vld [vmem:[%s3154_s12 + $0x20] sm:$0xff] }
 0xeb6   :  { %1880 = vmatpush.bf16.msrb.mxu3 %v2165_v20 }
 0xeba   :  { %1881 = vmatpush.bf16.msrb.mxu3 %v2164_v18 }
 0xf1f   :  { %v1718_v22 = vpop.xlane.xlu2 %1717 }
 0xf20   :  { %v1722_v23 = vmul.f32 0.032258064, %v1718_v22 }
 0xf22   :  { %2323 = vrsqrt.f32 %v1722_v23  ;;  %vm1731_vm14 = vcmp.eq.f32.partialorder %v1722_v23, inf  ;;  %v1734_v35 = vand.u32 2147483648, %v1722_v23  ;;  %vm1733_vm15 = vcmp.eq.f32.partialorder %v1722_v23, 0.0 }
 0xf27   :  { %v1721_v39 = vpop.xlane.xlu0 %1720 }
 0xf28   :  { %v2324_v25 = vpop.eup %2323  ;;  %v1723_v13 = vmul.f32 0.032258064, %v1721_v39 }
 0xf29   :  { %v1725_v40 = vmul.f32 %v2324_v25, %v1722_v23 }
 0xf2a   :  { %2325 = vrsqrt.f32 %v1723_v13  ;;  %vm1743_vm1 = vcmp.eq.f32.partialorder %v1723_v13, inf  ;;  %v1746_v60 = vand.u32 2147483648, %v1723_v13  ;;  %vm1745_vm2 = vcmp.eq.f32.partialorder %v1723_v13, 0.0 }
 0xf2b   :  { %v1726_v47 = vmul.f32 %v2324_v25, %v1725_v40 }
 0xf2d   :  { %v1727_v26 = vmul.f32 0.5, %v1726_v47  ;;  %v2230_v47 = vld [vmem:[%s3155_s13 + $0x1] ss:$0 sm:$0xff] }
 0xf2f   :  { %v1728_v42 = vsub.f32 1.5, %v1727_v26 }
 0xf30   :  { %v2326_v30 = vpop.eup %2325 }
 0xf31   :  { %v1729_v34 = vmul.f32 %v2324_v25, %v1728_v42  ;;  %v1737_v32 = vmul.f32 %v2326_v30, %v1723_v13 }
 0xf33   :  { %v1730_v31 = vmul.f32 %v1729_v34, %v1722_v23  ;;  %v1738_v54 = vmul.f32 %v2326_v30, %v1737_v32 }
 0xf35   :  { %v1732_v36 = vsel %vm1731_vm14, %v1722_v23, %v1730_v31  ;;  %v1739_v61 = vmul.f32 0.5, %v1738_v54  ;;  %v2229_v23 = vld [vmem:[%s3153_s11 + $0x1] ss:$0 sm:$0xff] }
 0xf36   :  { %v1735_v38 = vsel %vm1733_vm15, %v1734_v35, %v1732_v36 }
 0xf37   :  { %v1753_v59 = vadd.f32 1e-06, %v1735_v38  ;;  %v1740_v62 = vsub.f32 1.5, %v1739_v61 }
 0xf39   :  { %2327 = vrcp.f32 %v1753_v59  ;;  %v1741_v37 = vmul.f32 %v2326_v30, %v1740_v62  ;;  %v1766_v56 = vand.u32 2147483648, %v1753_v59  ;;  %vm1760_vm8 = vweird.f32 %v1753_v59 }
 0xf3a   :  { %v1764_v51 = vand.u32 2147483647, %v1753_v59 }
 0xf3b   :  { %v1742_v43 = vmul.f32 %v1741_v37, %v1723_v13  ;;  %v1767_v0 = vor.u32 1.1754944e-38, %v1766_v56 }
 0xf3c   :  { %vm1765_vm10 = vcmp.eq.f32.partialorder %v1764_v51, 8.507059e+37 }
 0xf3d   :  { %v1744_v41 = vsel %vm1743_vm1, %v1723_v13, %v1742_v43 }
 0xf3e   :  { %v1747_v44 = vsel %vm1745_vm2, %v1746_v60, %v1744_v41 }
 0xf3f   :  { %v2328_v45 = vpop.eup %2327  ;;  %v1754_v46 = vadd.f32 1e-06, %v1747_v44 }
 0xf40   :  { %v1756_v63 = vmul.f32 %v2328_v45, %v1753_v59  ;;  %vm1761_vm7 = vweird.f32 %v2328_v45 }
 0xf41   :  { %2329 = vrcp.f32 %v1754_v46  ;;  %vm1762_vm9 = vmor %vm1760_vm8, %vm1761_vm7  ;;  %v1781_v2 = vand.u32 2147483648, %v1754_v46  ;;  %v1779_v5 = vand.u32 2147483647, %v1754_v46  ;;  %vm1775_vm12 = vweird.f32 %v1754_v46 }
 0xf42   :  { %v1757_v49 = vsub.f32 1.0, %v1756_v63 }
 0xf43   :  { %v1782_v11 = vor.u32 1.1754944e-38, %v1781_v2  ;;  %vm1780_vm3 = vcmp.eq.f32.partialorder %v1779_v5, 8.507059e+37 }
 0xf44   :  { %v1758_v50 = vmul.f32 %v2328_v45, %v1757_v49 }
 0xf46   :  { %v1759_v52 = vadd.f32 %v2328_v45, %v1758_v50 }
 0xf47   :  { %v2330_v55 = vpop.eup %2329 }
 0xf48   :  { %v1771_v57 = vmul.f32 %v2330_v55, %v1754_v46  ;;  %v1763_v33 = vsel %vm1762_vm9, %v2328_v45, %v1759_v52  ;;  %vm1776_vm11 = vweird.f32 %v2330_v55 }
 0xf49   :  { %v1768_v1 = vsel %vm1765_vm10, %v1767_v0, %v1763_v33  ;;  %vm1777_vm13 = vmor %vm1775_vm12, %vm1776_vm11 }
 0xf4a   :  { %v1772_v58 = vsub.f32 1.0, %v1771_v57  ;;  %v1769_v8 = vmul.f32 %v1768_v1, %v1751_v4 }
 0xf4c   :  { %v1773_v3 = vmul.f32 %v2330_v55, %v1772_v58  ;;  %v1788_v16 = vadd.f32 %v2228_v12, %v1769_v8 }
 0xf4e   :  { %v1774_v6 = vadd.f32 %v2330_v55, %v1773_v3 }
 0xf50   :  { %v1778_v9 = vsel %vm1777_vm13, %v2330_v55, %v1774_v6 }
 0xf51   :  { %v1783_v14 = vsel %vm1780_vm3, %v1782_v11, %v1778_v9 }
 0xf52   :  { %v1784_v21 = vmul.f32 %v1783_v14, %v1752_v7 }
 0xf54   :  { %v1789_v17 = vadd.f32 %v2228_v12, %v1784_v21 }
 0xf56   :  { %v1790_v27 = vpack.c.bf16 %v1789_v17, %v1788_v16  ;;  %v2231_v16 = vld [vmem:[%s3156_s14] ss:$0 sm:$0xff]  ;;  %s2507_s14 = smov [#allocation11]  }
 0xf58   :  { %2121 = vmatmul.msk.bf16.vlgmr.msrb.gmra.mxu2 %vm139_vm0, %v1790_v27 }
 0xfdb   :  { %v1825_v22 = vpop.f32.mrf.mxu2 }
 0xfdc   :  { %v1826_v24 = vadd.f32 %v2229_v23, %v1825_v22 }
 0xfde   :  { %v1830_v25 = vmax.f32 %v1826_v24, 0.0  ;;  %v2232_v24 = vld [vmem:[%s3157_s15] ss:$0 sm:$0xff]  ;;  %s1985_s15 = sshll.u32 %s2507_s14, 4  ;;  %s1986_s15 = int_to_ptr.vmem [resolvable:$true] %s1985_s15 }
 0xfe3   :  { %v1827_v28 = vpop.f32.mrf.mxu2 }
 0xfe4   :  { %v1828_v39 = vadd.f32 %v2229_v23, %v1827_v28 }
 0xfe6   :  { %v1831_v13 = vmax.f32 %v1828_v39, 0.0 }
 0xfe8   :  { %v1832_v40 = vpack.c.bf16 %v1831_v13, %v1830_v25 }
 0xfea   :  { %2147 = vmatmul.msk.bf16.vlgmr.msrb.gmra.mxu3 %vm994_vm4, %v1832_v40 }
0x106d   :  { %v1883_v26 = vpop.f32.mrf.mxu3 }
0x106e   :  { %v1884_v42 = vadd.f32 %v2230_v47, %v1883_v26 }
0x1070   :  { %v1888_v30 = vadd.f32 %v1884_v42, %v3061_v29 }
0x1072   :  { %v1892_v34 = vsel %vm139_vm0, %v1888_v30, 0.0 }
0x1073   :  { %1893 = vadd.xlane.f32.xlu1 %v1892_v34 }
0x1075   :  { %v1885_v32 = vpop.f32.mrf.mxu3 }
0x1076   :  { %v1886_v31 = vadd.f32 %v2230_v47, %v1885_v32 }
0x1078   :  { %v1889_v54 = vadd.f32 %v1886_v31, %v3066_v53 }
0x107a   :  { %v1895_v35 = vsel %vm139_vm0, %v1889_v54, 0.0 }
0x107b   :  { %1896 = vadd.xlane.f32.xlu0 %v1895_v35 }
0x10e6   :  { %v1894_v36 = vpop.xlane.xlu1 %1893 }
0x10e7   :  { %v1898_v61 = vmul.f32 %v1894_v36, %v2625_v10 }
0x10e9   :  { %v1900_v38 = vsub.f32 %v1888_v30, %v1898_v61 }
0x10eb   :  { %v1902_v59 = vmul.f32 %v1900_v38, %v1900_v38  ;;  %v1939_v18 = vmul.f32 %v2231_v16, %v1900_v38 }
0x10ed   :  { %v1904_v62 = vsel %vm139_vm0, %v1902_v59, 0.0 }
0x10ee   :  { %v1897_v37 = vpop.xlane.xlu0 %1896  ;;  %1905 = vadd.xlane.f32.xlu2 %v1904_v62 }
0x10ef   :  { %v1899_v29 = vmul.f32 %v1897_v37, %v2625_v10 }
0x10f1   :  { %v3122_v43 = vsub.f32 %v1889_v54, %v1899_v29 }
0x10f3   :  { %v1903_v60 = vmul.f32 %v3122_v43, %v3122_v43  ;;  %v1940_v34 = vmul.f32 %v2231_v16, %v3122_v43 }
0x10f5   :  { %v1907_v53 = vsel %vm139_vm0, %v1903_v60, 0.0 }
0x10f6   :  { %1908 = vadd.xlane.f32.xlu1 %v1907_v53 }
0x1161   :  { %v1906_v41 = vpop.xlane.xlu2 %1905 }
0x1162   :  { %v1910_v44 = vmul.f32 0.032258064, %v1906_v41 }
0x1164   :  { %2331 = vrsqrt.f32 %v1910_v44  ;;  %vm1919_vm4 = vcmp.eq.f32.partialorder %v1910_v44, inf  ;;  %v1922_v33 = vand.u32 2147483648, %v1910_v44  ;;  %vm1921_vm5 = vcmp.eq.f32.partialorder %v1910_v44, 0.0 }
0x1169   :  { %v1909_v45 = vpop.xlane.xlu1 %1908 }
0x116a   :  { %v2332_v46 = vpop.eup %2331  ;;  %v1911_v63 = vmul.f32 0.032258064, %v1909_v45 }
0x116b   :  { %v1913_v49 = vmul.f32 %v2332_v46, %v1910_v44 }
0x116c   :  { %2333 = vrsqrt.f32 %v1911_v63  ;;  %vm1931_vm6 = vcmp.eq.f32.partialorder %v1911_v63, inf  ;;  %v1934_v6 = vand.u32 2147483648, %v1911_v63  ;;  %vm1933_vm14 = vcmp.eq.f32.partialorder %v1911_v63, 0.0 }
0x116d   :  { %v1914_v50 = vmul.f32 %v2332_v46, %v1913_v49 }
0x116f   :  { %v1915_v52 = vmul.f32 0.5, %v1914_v50 }
0x1171   :  { %v1916_v55 = vsub.f32 1.5, %v1915_v52 }
0x1172   :  { %v2334_v10 = vpop.eup %2333 }
0x1173   :  { %v1917_v56 = vmul.f32 %v2332_v46, %v1916_v55  ;;  %v1925_v51 = vmul.f32 %v2334_v10, %v1911_v63 }
0x1175   :  { %v1918_v57 = vmul.f32 %v1917_v56, %v1910_v44  ;;  %v1926_v48 = vmul.f32 %v2334_v10, %v1925_v51 }
0x1177   :  { %v1920_v58 = vsel %vm1919_vm4, %v1910_v44, %v1918_v57  ;;  %v1927_v0 = vmul.f32 0.5, %v1926_v48 }
0x1178   :  { %v1923_v2 = vsel %vm1921_vm5, %v1922_v33, %v1920_v58 }
0x1179   :  { %v1941_v3 = vadd.f32 1e-06, %v1923_v2  ;;  %v1928_v5 = vsub.f32 1.5, %v1927_v0 }
0x117b   :  { %2335 = vrcp.f32 %v1941_v3  ;;  %v1929_v1 = vmul.f32 %v2334_v10, %v1928_v5  ;;  %v1954_v21 = vand.u32 2147483648, %v1941_v3  ;;  %v1952_v27 = vand.u32 2147483647, %v1941_v3 }
0x117c   :  { %vm1948_vm1 = vweird.f32 %v1941_v3 }
0x117d   :  { %v1930_v4 = vmul.f32 %v1929_v1, %v1911_v63  ;;  %v1955_v20 = vor.u32 1.1754944e-38, %v1954_v21  ;;  %vm1953_vm7 = vcmp.eq.f32.partialorder %v1952_v27, 8.507059e+37 }
0x117f   :  { %v1932_v11 = vsel %vm1931_vm6, %v1911_v63, %v1930_v4 }
0x1180   :  { %v1935_v7 = vsel %vm1933_vm14, %v1934_v6, %v1932_v11 }
0x1181   :  { %v2336_v8 = vpop.eup %2335  ;;  %v1942_v9 = vadd.f32 1e-06, %v1935_v7 }
0x1182   :  { %v1944_v12 = vmul.f32 %v2336_v8, %v1941_v3  ;;  %vm1949_vm15 = vweird.f32 %v2336_v8 }
0x1183   :  { %2337 = vrcp.f32 %v1942_v9  ;;  %vm1950_vm2 = vmor %vm1948_vm1, %vm1949_vm15  ;;  %v1969_v13 = vand.u32 2147483648, %v1942_v9  ;;  %v1967_v47 = vand.u32 2147483647, %v1942_v9  ;;  %vm1963_vm9 = vweird.f32 %v1942_v9 }
0x1184   :  { %v1945_v14 = vsub.f32 1.0, %v1944_v12 }
0x1185   :  { %v1970_v30 = vor.u32 1.1754944e-38, %v1969_v13  ;;  %vm1968_vm11 = vcmp.eq.f32.partialorder %v1967_v47, 8.507059e+37 }
0x1186   :  { %v1946_v17 = vmul.f32 %v2336_v8, %v1945_v14 }
0x1188   :  { %v1947_v15 = vadd.f32 %v2336_v8, %v1946_v17 }
0x1189   :  { %v2338_v19 = vpop.eup %2337 }
0x118a   :  { %v1951_v22 = vsel %vm1950_vm2, %v2336_v8, %v1947_v15  ;;  %v1959_v23 = vmul.f32 %v2338_v19, %v1942_v9  ;;  %vm1964_vm8 = vweird.f32 %v2338_v19 }
0x118b   :  { %v1956_v28 = vsel %vm1953_vm7, %v1955_v20, %v1951_v22  ;;  %vm1965_vm10 = vmor %vm1963_vm9, %vm1964_vm8 }
0x118c   :  { %v1957_v39 = vmul.f32 %v1956_v28, %v1939_v18  ;;  %v1960_v25 = vsub.f32 1.0, %v1959_v23 }
0x118e   :  { %v1961_v40 = vmul.f32 %v2338_v19, %v1960_v25  ;;  %v1976_v26 = vadd.f32 %v2232_v24, %v1957_v39 }
0x1190   :  { %v1962_v42 = vadd.f32 %v2338_v19, %v1961_v40  ;;  %1978 = vst.msk [vmem:[#allocation11] sm:$0xff] %vm139_vm0, %v1976_v26 }
0x1192   :  { %v1966_v32 = vsel %vm1965_vm10, %v2338_v19, %v1962_v42 }
0x1193   :  { %v1971_v31 = vsel %vm1968_vm11, %v1970_v30, %v1966_v32 }
0x1194   :  { %v1972_v54 = vmul.f32 %v1971_v31, %v1940_v34 }
0x1196   :  { %v1977_v35 = vadd.f32 %v2232_v24, %v1972_v54 }
0x1198   :  { %1980 = vst.msk [vmem:[#allocation11 + $0x8] sm:$0xff] %vm139_vm0, %v1977_v35 }
0x1199   :  { %1993 = dma.vmem_to_hbm [thread:$0]  %s1986_s15, 256, %s1988_s6, [#allocation4], %s2496_s25, %s2496_s25, %s2497_s26  }
0x119a   :  { %2489 = dma.done.wait [#allocation4], 256  }
0x119b   :  { %2490 = vsyncadd [#allocation4], 4294967040 }
0x119c   :  { %1998 = vsyncpa [#allocation3], 1 }
0x119d   :  { %1999 = vsyncpa [#allocation6], 1 }
0x119e   :  { %2000 = vsyncpa [#allocation9], 1 }
0x119f   :  { %2001 = vsyncpa [#allocation4], 1 }

</bundles_post_ra>
